<compile_context>
chip_gen: v5e
topology: v5e:2x2
jax: 0.10.0
libtpu: 0.0.40
codegen_flags: <defaults>
</compile_context>

<pallas_src>
import jax
import jax.numpy as jnp
from jax.experimental import pallas as pl
from jax.experimental.pallas import tpu as pltpu

# -------------------- small-BERT config (scaled down from 768-dim BERT) -----
VOCAB, TYPE_VOCAB, MAX_POS = 128, 2, 64
HID, NH, DH, FFN, LAYERS = 128, 2, 64, 256, 2
START_POS = (25, 28, 31, 34, 37, 40)   # Comment_output_start positions
END_POS = (26, 29, 32, 35, 38, 41)     # Comment_output_end positions
NPOS = len(START_POS)
LN_EPS = 1e-12


# ------------------------------ in-kernel helpers ----------------------------
def _ln(x, g, b):
    mu = jnp.mean(x, axis=-1, keepdims=True)
    d = x - mu
    var = jnp.mean(d * d, axis=-1, keepdims=True)
    return d * jax.lax.rsqrt(var + LN_EPS) * g + b


def _gelu(x):
    # tanh-approx GELU (HF default 'gelu' is the erf form; tiny numerical delta)
    return 0.5 * x * (1.0 + jnp.tanh(0.7978845608028654 * (x + 0.044715 * x * x * x)))


def _log_softmax_sublane(v):
    # v: [N, 1]; log_softmax over the (sublane) position axis.
    m = jnp.max(v, axis=0, keepdims=True)
    y = v - m
    return y - jnp.log(jnp.sum(jnp.exp(y), axis=0, keepdims=True))


# ------------------------------ fused model kernel ---------------------------
def _bert_fused_kernel(emb_ref, bias_ref, emb_g_ref, emb_b_ref,
                       wqkv_ref, bqkv_ref, wo_ref, bo_ref,
                       ln1_g_ref, ln1_b_ref, w1_ref, b1_ref,
                       w2_ref, b2_ref, ln2_g_ref, ln2_b_ref,
                       qa_w_ref, qa_b_ref, sel_ref,
                       start_ref, end_ref, x_ref):
    l = pl.program_id(1)

    # layer 0: embedding layernorm directly into the VMEM-resident activation
    @pl.when(l == 0)
    def _init():
        x_ref[...] = _ln(emb_ref[0], emb_g_ref[...], emb_b_ref[...])

    x = x_ref[...]                               # [S, HID] f32
    xb = x.astype(jnp.bfloat16)
    bias = bias_ref[0]                           # [1, S] additive attention mask

    # ---- fused QKV projection (1/sqrt(DH) pre-folded into Q weights) ----
    qkv = jnp.dot(xb, wqkv_ref[0], preferred_element_type=jnp.float32) + bqkv_ref[0]

    # ---- per-head attention; context re-packed lane-dense [S, HID] ----
    ctx_heads = []
    for h in range(NH):
        qh = qkv[:, h * DH:(h + 1) * DH].astype(jnp.bfloat16)
        kh = qkv[:, HID + h * DH:HID + (h + 1) * DH].astype(jnp.bfloat16)
        vh = qkv[:, 2 * HID + h * DH:2 * HID + (h + 1) * DH].astype(jnp.bfloat16)
        s = jnp.einsum("qd,kd->qk", qh, kh,
                       preferred_element_type=jnp.float32) + bias      # [S, S]
        mmax = jnp.max(s, axis=-1, keepdims=True)
        p = jnp.exp(s - mmax)
        p = p * pl.reciprocal(jnp.sum(p, axis=-1, keepdims=True), approx=True)
        ctx_heads.append(jnp.dot(p.astype(jnp.bfloat16), vh,
                                 preferred_element_type=jnp.float32))  # [S, DH]
    ctx = jnp.concatenate(ctx_heads, axis=-1)    # [S, HID]

    # ---- attention output projection + add&norm ----
    attn = jnp.dot(ctx.astype(jnp.bfloat16), wo_ref[0],
                   preferred_element_type=jnp.float32) + bo_ref[0]
    x1 = _ln(attn + x, ln1_g_ref[0], ln1_b_ref[0])

    # ---- feed-forward + add&norm ----
    h1 = jnp.dot(x1.astype(jnp.bfloat16), w1_ref[0],
                 preferred_element_type=jnp.float32) + b1_ref[0]
    h1 = _gelu(h1)
    h2 = jnp.dot(h1.astype(jnp.bfloat16), w2_ref[0],
                 preferred_element_type=jnp.float32) + b2_ref[0]
    x2 = _ln(h2 + x1, ln2_g_ref[0], ln2_b_ref[0])
    x_ref[...] = x2

    # ---- last layer: fused QA head + fixed-position gather + log_softmax ----
    @pl.when(l == pl.num_programs(1) - 1)
    def _tail():
        # one-hot row-gather of the 2*NPOS needed positions via the MXU
        xg = jnp.dot(sel_ref[...], x2.astype(jnp.bfloat16),
                     preferred_element_type=jnp.float32)               # [2*NPOS, HID]
        lg = jnp.dot(xg.astype(jnp.bfloat16), qa_w_ref[...],
                     preferred_element_type=jnp.float32) + qa_b_ref[...]  # [2*NPOS, 2]
        start_ref[0] = _log_softmax_sublane(lg[:NPOS, 0:1])            # start logits
        end_ref[0] = _log_softmax_sublane(lg[NPOS:, 1:2])              # end logits


# ------------------------------ parameters -----------------------------------
def init_params(key):
    keys = iter(jax.random.split(key, 32))

    def rnd(shape):
        return jax.random.normal(next(keys), shape, jnp.float32) * 0.02

    scale = 1.0 / (DH ** 0.5)
    wq, wk, wv = rnd((LAYERS, HID, HID)), rnd((LAYERS, HID, HID)), rnd((LAYERS, HID, HID))
    wqkv = jnp.concatenate([wq * scale, wk, wv], axis=-1)   # scale folded into Q

    return {
        "word_emb": rnd((VOCAB, HID)),
        "type_emb": rnd((TYPE_VOCAB, HID)),
        "pos_emb": rnd((MAX_POS, HID)),
        "emb_ln_g": jnp.ones((1, HID), jnp.float32),
        "emb_ln_b": jnp.zeros((1, HID), jnp.float32),
        "wqkv": wqkv.astype(jnp.bfloat16),
        "bqkv": jnp.zeros((LAYERS, 1, 3 * HID), jnp.float32),
        "wo": rnd((LAYERS, HID, HID)).astype(jnp.bfloat16),
        "bo": jnp.zeros((LAYERS, 1, HID), jnp.float32),
        "ln1_g": jnp.ones((LAYERS, 1, HID), jnp.float32),
        "ln1_b": jnp.zeros((LAYERS, 1, HID), jnp.float32),
        "w1": rnd((LAYERS, HID, FFN)).astype(jnp.bfloat16),
        "b1": jnp.zeros((LAYERS, 1, FFN), jnp.float32),
        "w2": rnd((LAYERS, FFN, HID)).astype(jnp.bfloat16),
        "b2": jnp.zeros((LAYERS, 1, HID), jnp.float32),
        "ln2_g": jnp.ones((LAYERS, 1, HID), jnp.float32),
        "ln2_b": jnp.zeros((LAYERS, 1, HID), jnp.float32),
        "qa_w": rnd((HID, 2)).astype(jnp.bfloat16),
        "qa_b": jnp.zeros((1, 2), jnp.float32),
    }


# ------------------------------ forward pass ----------------------------------
def forward(params, input_ids, token_type_ids, attention_mask):
    B, S = input_ids.shape

    # embedding gathers (plain-JAX glue)
    emb = (params["word_emb"][input_ids]
           + params["type_emb"][token_type_ids]
           + params["pos_emb"][:S][None, :, :]).astype(jnp.float32)        # [B,S,HID]
    bias = ((1.0 - attention_mask.astype(jnp.float32)) * -10000.0).reshape(B, 1, S)
    sel = jax.nn.one_hot(jnp.array(START_POS + END_POS, jnp.int32), S,
                         dtype=jnp.float32).astype(jnp.bfloat16)           # [2*NPOS,S]

    inputs = (emb, bias, params["emb_ln_g"], params["emb_ln_b"],
              params["wqkv"], params["bqkv"], params["wo"], params["bo"],
              params["ln1_g"], params["ln1_b"], params["w1"], params["b1"],
              params["w2"], params["b2"], params["ln2_g"], params["ln2_b"],
              params["qa_w"], params["qa_b"], sel)

    # rough roofline hint for XLA scheduling
    flops_layer = (2 * S * HID * 3 * HID + NH * 4 * S * S * DH
                   + 2 * S * HID * HID + 4 * S * HID * FFN)
    flops = B * (LAYERS * flops_layer
                 + 2 * (2 * NPOS) * S * HID + 2 * (2 * NPOS) * HID * 2)
    transcendentals = B * LAYERS * (NH * S * S + S * FFN) + B * 4 * NPOS
    bytes_accessed = (sum(int(a.size) * a.dtype.itemsize for a in inputs)
                      + 2 * B * NPOS * 4)

    batch3 = lambda b, l: (b, 0, 0)
    layer3 = lambda b, l: (l, 0, 0)
    glob2 = lambda b, l: (0, 0)

    in_specs = [
        pl.BlockSpec((1, S, HID), batch3),            # emb
        pl.BlockSpec((1, 1, S), batch3),              # attention bias
        pl.BlockSpec((1, HID), glob2),                # emb_ln_g
        pl.BlockSpec((1, HID), glob2),                # emb_ln_b
        pl.BlockSpec((1, HID, 3 * HID), layer3),      # wqkv
        pl.BlockSpec((1, 1, 3 * HID), layer3),        # bqkv
        pl.BlockSpec((1, HID, HID), layer3),          # wo
        pl.BlockSpec((1, 1, HID), layer3),            # bo
        pl.BlockSpec((1, 1, HID), layer3),            # ln1_g
        pl.BlockSpec((1, 1, HID), layer3),            # ln1_b
        pl.BlockSpec((1, HID, FFN), layer3),          # w1
        pl.BlockSpec((1, 1, FFN), layer3),            # b1
        pl.BlockSpec((1, FFN, HID), layer3),          # w2
        pl.BlockSpec((1, 1, HID), layer3),            # b2
        pl.BlockSpec((1, 1, HID), layer3),            # ln2_g
        pl.BlockSpec((1, 1, HID), layer3),            # ln2_b
        pl.BlockSpec((HID, 2), glob2),                # qa_w
        pl.BlockSpec((1, 2), glob2),                  # qa_b
        pl.BlockSpec((2 * NPOS, S), glob2),           # position-gather one-hot
    ]
    out_specs = (pl.BlockSpec((1, NPOS, 1), batch3),
                 pl.BlockSpec((1, NPOS, 1), batch3))

    start, end = pl.pallas_call(
        _bert_fused_kernel,
        out_shape=(jax.ShapeDtypeStruct((B, NPOS, 1), jnp.float32),
                   jax.ShapeDtypeStruct((B, NPOS, 1), jnp.float32)),
        grid=(B, LAYERS),
        in_specs=in_specs,
        out_specs=out_specs,
        scratch_shapes=[pltpu.VMEM((S, HID), jnp.float32)],   # resident activation
        compiler_params=pltpu.CompilerParams(
            dimension_semantics=("parallel", "arbitrary")),
        cost_estimate=pl.CostEstimate(flops=flops,
                                      transcendentals=transcendentals,
                                      bytes_accessed=bytes_accessed),
    )(*inputs)

    return start[..., 0], end[..., 0]


# ----------------------------------- main -------------------------------------
if __name__ == "__main__":
    key = jax.random.PRNGKey(0)
    pkey, ikey = jax.random.split(key)
    params = init_params(pkey)

    B, S = 2, 48  # S must cover gather positions up to 41
    input_ids = jax.random.randint(ikey, (B, S), 0, VOCAB, dtype=jnp.int32)
    token_type_ids = jnp.zeros((B, S), jnp.int32)
    attention_mask = jnp.ones((B, S), jnp.int32)

    start_pred, end_pred = forward(params, input_ids, token_type_ids, attention_mask)
    jax.block_until_ready((start_pred, end_pred))

    assert start_pred.shape == (B, NPOS) and end_pred.shape == (B, NPOS)
    # log_softmax rows must exponentiate-sum to ~1
    assert jnp.allclose(jnp.exp(start_pred).sum(-1), 1.0, atol=1e-4)
    assert jnp.allclose(jnp.exp(end_pred).sum(-1), 1.0, atol=1e-4)
    print("KERNEL_OK")
</pallas_src>

<mosaic_0001>
module attributes {stable_mosaic.version = 11 : i64} {
  func.func @_bert_fused_kernel(%arg0: i32, %arg1: i32, %arg2: memref<1x48x128xf32, #tpu.memory_space<vmem>>, %arg3: memref<1x1x48xf32, #tpu.memory_space<vmem>>, %arg4: memref<1x128xf32, #tpu.memory_space<vmem>>, %arg5: memref<1x128xf32, #tpu.memory_space<vmem>>, %arg6: memref<1x128x384xbf16, #tpu.memory_space<vmem>>, %arg7: memref<1x1x384xf32, #tpu.memory_space<vmem>>, %arg8: memref<1x128x128xbf16, #tpu.memory_space<vmem>>, %arg9: memref<1x1x128xf32, #tpu.memory_space<vmem>>, %arg10: memref<1x1x128xf32, #tpu.memory_space<vmem>>, %arg11: memref<1x1x128xf32, #tpu.memory_space<vmem>>, %arg12: memref<1x128x256xbf16, #tpu.memory_space<vmem>>, %arg13: memref<1x1x256xf32, #tpu.memory_space<vmem>>, %arg14: memref<1x256x128xbf16, #tpu.memory_space<vmem>>, %arg15: memref<1x1x128xf32, #tpu.memory_space<vmem>>, %arg16: memref<1x1x128xf32, #tpu.memory_space<vmem>>, %arg17: memref<1x1x128xf32, #tpu.memory_space<vmem>>, %arg18: memref<128x2xbf16, #tpu.memory_space<vmem>>, %arg19: memref<1x2xf32, #tpu.memory_space<vmem>>, %arg20: memref<12x48xbf16, #tpu.memory_space<vmem>>, %arg21: memref<1x6x1xf32, #tpu.memory_space<vmem>>, %arg22: memref<1x6x1xf32, #tpu.memory_space<vmem>>, %arg23: memref<48x128xf32, #tpu.memory_space<vmem>>) attributes {dimension_semantics = [#tpu.dimension_semantics<parallel>, #tpu.dimension_semantics<arbitrary>], iteration_bounds = array<i64: 2, 2>, scalar_prefetch = 0 : i64, scratch_operands = 1 : i64, tpu.core_type = #tpu.core_type<tc>, window_params = [{transform_indices = @transform_0, window_bounds = array<i64: 1, 48, 128>}, {transform_indices = @transform_1, window_bounds = array<i64: 1, 1, 48>}, {pipeline_mode = #tpu.pipeline_mode<synchronous>, transform_indices = @transform_2, window_bounds = array<i64: 1, 128>}, {pipeline_mode = #tpu.pipeline_mode<synchronous>, transform_indices = @transform_3, window_bounds = array<i64: 1, 128>}, {transform_indices = @transform_4, window_bounds = array<i64: 1, 128, 384>}, {transform_indices = @transform_5, window_bounds = array<i64: 1, 1, 384>}, {transform_indices = @transform_6, window_bounds = array<i64: 1, 128, 128>}, {transform_indices = @transform_7, window_bounds = array<i64: 1, 1, 128>}, {transform_indices = @transform_8, window_bounds = array<i64: 1, 1, 128>}, {transform_indices = @transform_9, window_bounds = array<i64: 1, 1, 128>}, {transform_indices = @transform_10, window_bounds = array<i64: 1, 128, 256>}, {transform_indices = @transform_11, window_bounds = array<i64: 1, 1, 256>}, {transform_indices = @transform_12, window_bounds = array<i64: 1, 256, 128>}, {transform_indices = @transform_13, window_bounds = array<i64: 1, 1, 128>}, {transform_indices = @transform_14, window_bounds = array<i64: 1, 1, 128>}, {transform_indices = @transform_15, window_bounds = array<i64: 1, 1, 128>}, {pipeline_mode = #tpu.pipeline_mode<synchronous>, transform_indices = @transform_16, window_bounds = array<i64: 128, 2>}, {pipeline_mode = #tpu.pipeline_mode<synchronous>, transform_indices = @transform_17, window_bounds = array<i64: 1, 2>}, {pipeline_mode = #tpu.pipeline_mode<synchronous>, transform_indices = @transform_18, window_bounds = array<i64: 12, 48>}, {transform_indices = @transform_19, window_bounds = array<i64: 1, 6, 1>}, {transform_indices = @transform_20, window_bounds = array<i64: 1, 6, 1>}]} {
    %c0_i32 = arith.constant 0 : i32
    %0 = arith.cmpi eq, %arg1, %c0_i32 : i32
    %1 = arith.extui %0 : i1 to i32
    %c0_i32_0 = arith.constant 0 : i32
    %2 = arith.cmpi ne, %1, %c0_i32_0 : i32
    scf.if %2 {
      %c0_69 = arith.constant 0 : index
      %c0_70 = arith.constant 0 : index
      %c0_71 = arith.constant 0 : index
      %148 = vector.load %arg2[%c0_69, %c0_70, %c0_71] : memref<1x48x128xf32, #tpu.memory_space<vmem>>, vector<1x48x128xf32>
      %149 = vector.shape_cast %148 : vector<1x48x128xf32> to vector<48x128xf32>
      %c0_72 = arith.constant 0 : index
      %c0_73 = arith.constant 0 : index
      %150 = vector.load %arg4[%c0_72, %c0_73] : memref<1x128xf32, #tpu.memory_space<vmem>>, vector<1x128xf32>
      %c0_74 = arith.constant 0 : index
      %c0_75 = arith.constant 0 : index
      %151 = vector.load %arg5[%c0_74, %c0_75] : memref<1x128xf32, #tpu.memory_space<vmem>>, vector<1x128xf32>
      %cst_76 = arith.constant dense<0.000000e+00> : vector<48xf32>
      %152 = vector.multi_reduction <add>, %149, %cst_76 [1] : vector<48x128xf32> to vector<48xf32>
      %153 = vector.shape_cast %152 : vector<48xf32> to vector<48x1xf32>
      %cst_77 = arith.constant 1.280000e+02 : f32
      %154 = vector.broadcast %cst_77 : f32 to vector<48x1xf32>
      %155 = arith.divf %153, %154 : vector<48x1xf32>
      %156 = vector.broadcast %155 : vector<48x1xf32> to vector<48x128xf32>
      %157 = arith.subf %149, %156 : vector<48x128xf32>
      %158 = arith.mulf %157, %157 : vector<48x128xf32>
      %cst_78 = arith.constant dense<0.000000e+00> : vector<48xf32>
      %159 = vector.multi_reduction <add>, %158, %cst_78 [1] : vector<48x128xf32> to vector<48xf32>
      %160 = vector.shape_cast %159 : vector<48xf32> to vector<48x1xf32>
      %cst_79 = arith.constant 1.280000e+02 : f32
      %161 = vector.broadcast %cst_79 : f32 to vector<48x1xf32>
      %162 = arith.divf %160, %161 : vector<48x1xf32>
      %cst_80 = arith.constant 9.99999996E-13 : f32
      %163 = vector.broadcast %cst_80 : f32 to vector<48x1xf32>
      %164 = arith.addf %162, %163 : vector<48x1xf32>
      %165 = math.rsqrt %164 : vector<48x1xf32>
      %166 = vector.broadcast %165 : vector<48x1xf32> to vector<48x128xf32>
      %167 = arith.mulf %157, %166 : vector<48x128xf32>
      %168 = vector.broadcast %150 : vector<1x128xf32> to vector<48x128xf32>
      %169 = arith.mulf %167, %168 : vector<48x128xf32>
      %170 = vector.broadcast %151 : vector<1x128xf32> to vector<48x128xf32>
      %171 = arith.addf %169, %170 : vector<48x128xf32>
      %c0_81 = arith.constant 0 : index
      %c0_82 = arith.constant 0 : index
      %172 = vector.load %arg23[%c0_81, %c0_82] : memref<48x128xf32, #tpu.memory_space<vmem>>, vector<48x128xf32>
      tpu.vector_store %arg23[%c0_81, %c0_82], %171 {strides = array<i32>} : memref<48x128xf32, #tpu.memory_space<vmem>>, vector<48x128xf32>,
    } else {
    }
    %c0 = arith.constant 0 : index
    %c0_1 = arith.constant 0 : index
    %3 = vector.load %arg23[%c0, %c0_1] : memref<48x128xf32, #tpu.memory_space<vmem>>, vector<48x128xf32>
    %4 = arith.truncf %3 : vector<48x128xf32> to vector<48x128xbf16>
    %c0_2 = arith.constant 0 : index
    %c0_3 = arith.constant 0 : index
    %c0_4 = arith.constant 0 : index
    %5 = vector.load %arg3[%c0_2, %c0_3, %c0_4] : memref<1x1x48xf32, #tpu.memory_space<vmem>>, vector<1x1x48xf32>
    %6 = vector.shape_cast %5 : vector<1x1x48xf32> to vector<1x48xf32>
    %c0_5 = arith.constant 0 : index
    %c0_6 = arith.constant 0 : index
    %c0_7 = arith.constant 0 : index
    %7 = vector.load %arg6[%c0_5, %c0_6, %c0_7] : memref<1x128x384xbf16, #tpu.memory_space<vmem>>, vector<1x128x384xbf16>
    %8 = vector.shape_cast %7 : vector<1x128x384xbf16> to vector<128x384xbf16>
    %cst = arith.constant dense<0.000000e+00> : vector<48x384xf32>
    %9 = tpu.matmul %4, %8, %cst {dimension_numbers = #tpu.dot_dimension_numbers<[1], [0], [0], [1], [0, 0, 1, 1], [], []>} : vector<48x128xbf16>, vector<128x384xbf16>, vector<48x384xf32> -> vector<48x384xf32>
    %c0_8 = arith.constant 0 : index
    %c0_9 = arith.constant 0 : index
    %c0_10 = arith.constant 0 : index
    %10 = vector.load %arg7[%c0_8, %c0_9, %c0_10] : memref<1x1x384xf32, #tpu.memory_space<vmem>>, vector<1x1x384xf32>
    %11 = vector.shape_cast %10 : vector<1x1x384xf32> to vector<1x384xf32>
    %12 = vector.broadcast %11 : vector<1x384xf32> to vector<48x384xf32>
    %13 = arith.addf %9, %12 : vector<48x384xf32>
    %14 = vector.extract_strided_slice %13 {offsets = [0, 0], sizes = [48, 64], strides = [1, 1]} : vector<48x384xf32> to vector<48x64xf32>
    %15 = arith.truncf %14 : vector<48x64xf32> to vector<48x64xbf16>
    %16 = vector.extract_strided_slice %13 {offsets = [0, 128], sizes = [48, 64], strides = [1, 1]} : vector<48x384xf32> to vector<48x64xf32>
    %17 = arith.truncf %16 : vector<48x64xf32> to vector<48x64xbf16>
    %18 = vector.extract_strided_slice %13 {offsets = [0, 256], sizes = [48, 64], strides = [1, 1]} : vector<48x384xf32> to vector<48x64xf32>
    %19 = arith.truncf %18 : vector<48x64xf32> to vector<48x64xbf16>
    "tpu.trace_start"() <{level = 10 : i32, message = "qd,kd->qk"}> : () -> ()
    %cst_11 = arith.constant dense<0.000000e+00> : vector<48x48xf32>
    %20 = tpu.matmul %15, %17, %cst_11 {dimension_numbers = #tpu.dot_dimension_numbers<[1], [1], [0], [0], [0, 0, 1, 0], [], []>} : vector<48x64xbf16>, vector<48x64xbf16>, vector<48x48xf32> -> vector<48x48xf32>
    "tpu.trace_stop"() : () -> ()
    %21 = vector.broadcast %6 : vector<1x48xf32> to vector<48x48xf32>
    %22 = arith.addf %20, %21 : vector<48x48xf32>
    %cst_12 = arith.constant dense<0xFF800000> : vector<48xf32>
    %23 = vector.multi_reduction <maximumf>, %22, %cst_12 [1] : vector<48x48xf32> to vector<48xf32>
    %24 = vector.shape_cast %23 : vector<48xf32> to vector<48x1xf32>
    %25 = vector.broadcast %24 : vector<48x1xf32> to vector<48x48xf32>
    %26 = arith.subf %22, %25 : vector<48x48xf32>
    %27 = math.exp %26 : vector<48x48xf32>
    %cst_13 = arith.constant dense<0.000000e+00> : vector<48xf32>
    %28 = vector.multi_reduction <add>, %27, %cst_13 [1] : vector<48x48xf32> to vector<48xf32>
    %29 = vector.shape_cast %28 : vector<48xf32> to vector<48x1xf32>
    %30 = tpu.reciprocal %29 {approx = true} : vector<48x1xf32> -> vector<48x1xf32>
    %31 = vector.broadcast %30 : vector<48x1xf32> to vector<48x48xf32>
    %32 = arith.mulf %27, %31 : vector<48x48xf32>
    %33 = arith.truncf %32 : vector<48x48xf32> to vector<48x48xbf16>
    %cst_14 = arith.constant dense<0.000000e+00> : vector<48x64xf32>
    %34 = tpu.matmul %33, %19, %cst_14 {dimension_numbers = #tpu.dot_dimension_numbers<[1], [0], [0], [1], [0, 0, 1, 1], [], []>} : vector<48x48xbf16>, vector<48x64xbf16>, vector<48x64xf32> -> vector<48x64xf32>
    %35 = vector.extract_strided_slice %13 {offsets = [0, 64], sizes = [48, 64], strides = [1, 1]} : vector<48x384xf32> to vector<48x64xf32>
    %36 = arith.truncf %35 : vector<48x64xf32> to vector<48x64xbf16>
    %37 = vector.extract_strided_slice %13 {offsets = [0, 192], sizes = [48, 64], strides = [1, 1]} : vector<48x384xf32> to vector<48x64xf32>
    %38 = arith.truncf %37 : vector<48x64xf32> to vector<48x64xbf16>
    %39 = vector.extract_strided_slice %13 {offsets = [0, 320], sizes = [48, 64], strides = [1, 1]} : vector<48x384xf32> to vector<48x64xf32>
    %40 = arith.truncf %39 : vector<48x64xf32> to vector<48x64xbf16>
    "tpu.trace_start"() <{level = 10 : i32, message = "qd,kd->qk"}> : () -> ()
    %cst_15 = arith.constant dense<0.000000e+00> : vector<48x48xf32>
    %41 = tpu.matmul %36, %38, %cst_15 {dimension_numbers = #tpu.dot_dimension_numbers<[1], [1], [0], [0], [0, 0, 1, 0], [], []>} : vector<48x64xbf16>, vector<48x64xbf16>, vector<48x48xf32> -> vector<48x48xf32>
    "tpu.trace_stop"() : () -> ()
    %42 = vector.broadcast %6 : vector<1x48xf32> to vector<48x48xf32>
    %43 = arith.addf %41, %42 : vector<48x48xf32>
    %cst_16 = arith.constant dense<0xFF800000> : vector<48xf32>
    %44 = vector.multi_reduction <maximumf>, %43, %cst_16 [1] : vector<48x48xf32> to vector<48xf32>
    %45 = vector.shape_cast %44 : vector<48xf32> to vector<48x1xf32>
    %46 = vector.broadcast %45 : vector<48x1xf32> to vector<48x48xf32>
    %47 = arith.subf %43, %46 : vector<48x48xf32>
    %48 = math.exp %47 : vector<48x48xf32>
    %cst_17 = arith.constant dense<0.000000e+00> : vector<48xf32>
    %49 = vector.multi_reduction <add>, %48, %cst_17 [1] : vector<48x48xf32> to vector<48xf32>
    %50 = vector.shape_cast %49 : vector<48xf32> to vector<48x1xf32>
    %51 = tpu.reciprocal %50 {approx = true} : vector<48x1xf32> -> vector<48x1xf32>
    %52 = vector.broadcast %51 : vector<48x1xf32> to vector<48x48xf32>
    %53 = arith.mulf %48, %52 : vector<48x48xf32>
    %54 = arith.truncf %53 : vector<48x48xf32> to vector<48x48xbf16>
    %cst_18 = arith.constant dense<0.000000e+00> : vector<48x64xf32>
    %55 = tpu.matmul %54, %40, %cst_18 {dimension_numbers = #tpu.dot_dimension_numbers<[1], [0], [0], [1], [0, 0, 1, 1], [], []>} : vector<48x48xbf16>, vector<48x64xbf16>, vector<48x64xf32> -> vector<48x64xf32>
    %56 = tpu.concatenate %34, %55 in 1 : vector<48x64xf32>, vector<48x64xf32> -> vector<48x128xf32>
    %57 = arith.truncf %56 : vector<48x128xf32> to vector<48x128xbf16>
    %c0_19 = arith.constant 0 : index
    %c0_20 = arith.constant 0 : index
    %c0_21 = arith.constant 0 : index
    %58 = vector.load %arg8[%c0_19, %c0_20, %c0_21] : memref<1x128x128xbf16, #tpu.memory_space<vmem>>, vector<1x128x128xbf16>
    %59 = vector.shape_cast %58 : vector<1x128x128xbf16> to vector<128x128xbf16>
    %cst_22 = arith.constant dense<0.000000e+00> : vector<48x128xf32>
    %60 = tpu.matmul %57, %59, %cst_22 {dimension_numbers = #tpu.dot_dimension_numbers<[1], [0], [0], [1], [0, 0, 1, 1], [], []>} : vector<48x128xbf16>, vector<128x128xbf16>, vector<48x128xf32> -> vector<48x128xf32>
    %c0_23 = arith.constant 0 : index
    %c0_24 = arith.constant 0 : index
    %c0_25 = arith.constant 0 : index
    %61 = vector.load %arg9[%c0_23, %c0_24, %c0_25] : memref<1x1x128xf32, #tpu.memory_space<vmem>>, vector<1x1x128xf32>
    %62 = vector.shape_cast %61 : vector<1x1x128xf32> to vector<1x128xf32>
    %63 = vector.broadcast %62 : vector<1x128xf32> to vector<48x128xf32>
    %64 = arith.addf %60, %63 : vector<48x128xf32>
    %65 = arith.addf %64, %3 : vector<48x128xf32>
    %c0_26 = arith.constant 0 : index
    %c0_27 = arith.constant 0 : index
    %c0_28 = arith.constant 0 : index
    %66 = vector.load %arg10[%c0_26, %c0_27, %c0_28] : memref<1x1x128xf32, #tpu.memory_space<vmem>>, vector<1x1x128xf32>
    %67 = vector.shape_cast %66 : vector<1x1x128xf32> to vector<1x128xf32>
    %c0_29 = arith.constant 0 : index
    %c0_30 = arith.constant 0 : index
    %c0_31 = arith.constant 0 : index
    %68 = vector.load %arg11[%c0_29, %c0_30, %c0_31] : memref<1x1x128xf32, #tpu.memory_space<vmem>>, vector<1x1x128xf32>
    %69 = vector.shape_cast %68 : vector<1x1x128xf32> to vector<1x128xf32>
    %cst_32 = arith.constant dense<0.000000e+00> : vector<48xf32>
    %70 = vector.multi_reduction <add>, %65, %cst_32 [1] : vector<48x128xf32> to vector<48xf32>
    %71 = vector.shape_cast %70 : vector<48xf32> to vector<48x1xf32>
    %cst_33 = arith.constant 1.280000e+02 : f32
    %72 = vector.broadcast %cst_33 : f32 to vector<48x1xf32>
    %73 = arith.divf %71, %72 : vector<48x1xf32>
    %74 = vector.broadcast %73 : vector<48x1xf32> to vector<48x128xf32>
    %75 = arith.subf %65, %74 : vector<48x128xf32>
    %76 = arith.mulf %75, %75 : vector<48x128xf32>
    %cst_34 = arith.constant dense<0.000000e+00> : vector<48xf32>
    %77 = vector.multi_reduction <add>, %76, %cst_34 [1] : vector<48x128xf32> to vector<48xf32>
    %78 = vector.shape_cast %77 : vector<48xf32> to vector<48x1xf32>
    %cst_35 = arith.constant 1.280000e+02 : f32
    %79 = vector.broadcast %cst_35 : f32 to vector<48x1xf32>
    %80 = arith.divf %78, %79 : vector<48x1xf32>
    %cst_36 = arith.constant 9.99999996E-13 : f32
    %81 = vector.broadcast %cst_36 : f32 to vector<48x1xf32>
    %82 = arith.addf %80, %81 : vector<48x1xf32>
    %83 = math.rsqrt %82 : vector<48x1xf32>
    %84 = vector.broadcast %83 : vector<48x1xf32> to vector<48x128xf32>
    %85 = arith.mulf %75, %84 : vector<48x128xf32>
    %86 = vector.broadcast %67 : vector<1x128xf32> to vector<48x128xf32>
    %87 = arith.mulf %85, %86 : vector<48x128xf32>
    %88 = vector.broadcast %69 : vector<1x128xf32> to vector<48x128xf32>
    %89 = arith.addf %87, %88 : vector<48x128xf32>
    %90 = arith.truncf %89 : vector<48x128xf32> to vector<48x128xbf16>
    %c0_37 = arith.constant 0 : index
    %c0_38 = arith.constant 0 : index
    %c0_39 = arith.constant 0 : index
    %91 = vector.load %arg12[%c0_37, %c0_38, %c0_39] : memref<1x128x256xbf16, #tpu.memory_space<vmem>>, vector<1x128x256xbf16>
    %92 = vector.shape_cast %91 : vector<1x128x256xbf16> to vector<128x256xbf16>
    %cst_40 = arith.constant dense<0.000000e+00> : vector<48x256xf32>
    %93 = tpu.matmul %90, %92, %cst_40 {dimension_numbers = #tpu.dot_dimension_numbers<[1], [0], [0], [1], [0, 0, 1, 1], [], []>} : vector<48x128xbf16>, vector<128x256xbf16>, vector<48x256xf32> -> vector<48x256xf32>
    %c0_41 = arith.constant 0 : index
    %c0_42 = arith.constant 0 : index
    %c0_43 = arith.constant 0 : index
    %94 = vector.load %arg13[%c0_41, %c0_42, %c0_43] : memref<1x1x256xf32, #tpu.memory_space<vmem>>, vector<1x1x256xf32>
    %95 = vector.shape_cast %94 : vector<1x1x256xf32> to vector<1x256xf32>
    %96 = vector.broadcast %95 : vector<1x256xf32> to vector<48x256xf32>
    %97 = arith.addf %93, %96 : vector<48x256xf32>
    %cst_44 = arith.constant 5.000000e-01 : f32
    %98 = vector.broadcast %cst_44 : f32 to vector<48x256xf32>
    %99 = arith.mulf %98, %97 : vector<48x256xf32>
    %cst_45 = arith.constant 4.471500e-02 : f32
    %100 = vector.broadcast %cst_45 : f32 to vector<48x256xf32>
    %101 = arith.mulf %100, %97 : vector<48x256xf32>
    %102 = arith.mulf %101, %97 : vector<48x256xf32>
    %103 = arith.mulf %102, %97 : vector<48x256xf32>
    %104 = arith.addf %97, %103 : vector<48x256xf32>
    %cst_46 = arith.constant 0.797884583 : f32
    %105 = vector.broadcast %cst_46 : f32 to vector<48x256xf32>
    %106 = arith.mulf %105, %104 : vector<48x256xf32>
    %107 = math.tanh %106 : vector<48x256xf32>
    %cst_47 = arith.constant 1.000000e+00 : f32
    %108 = vector.broadcast %cst_47 : f32 to vector<48x256xf32>
    %109 = arith.addf %108, %107 : vector<48x256xf32>
    %110 = arith.mulf %99, %109 : vector<48x256xf32>
    %111 = arith.truncf %110 : vector<48x256xf32> to vector<48x256xbf16>
    %c0_48 = arith.constant 0 : index
    %c0_49 = arith.constant 0 : index
    %c0_50 = arith.constant 0 : index
    %112 = vector.load %arg14[%c0_48, %c0_49, %c0_50] : memref<1x256x128xbf16, #tpu.memory_space<vmem>>, vector<1x256x128xbf16>
    %113 = vector.shape_cast %112 : vector<1x256x128xbf16> to vector<256x128xbf16>
    %cst_51 = arith.constant dense<0.000000e+00> : vector<48x128xf32>
    %114 = tpu.matmul %111, %113, %cst_51 {dimension_numbers = #tpu.dot_dimension_numbers<[1], [0], [0], [1], [0, 0, 1, 1], [], []>} : vector<48x256xbf16>, vector<256x128xbf16>, vector<48x128xf32> -> vector<48x128xf32>
    %c0_52 = arith.constant 0 : index
    %c0_53 = arith.constant 0 : index
    %c0_54 = arith.constant 0 : index
    %115 = vector.load %arg15[%c0_52, %c0_53, %c0_54] : memref<1x1x128xf32, #tpu.memory_space<vmem>>, vector<1x1x128xf32>
    %116 = vector.shape_cast %115 : vector<1x1x128xf32> to vector<1x128xf32>
    %117 = vector.broadcast %116 : vector<1x128xf32> to vector<48x128xf32>
    %118 = arith.addf %114, %117 : vector<48x128xf32>
    %119 = arith.addf %118, %89 : vector<48x128xf32>
    %c0_55 = arith.constant 0 : index
    %c0_56 = arith.constant 0 : index
    %c0_57 = arith.constant 0 : index
    %120 = vector.load %arg16[%c0_55, %c0_56, %c0_57] : memref<1x1x128xf32, #tpu.memory_space<vmem>>, vector<1x1x128xf32>
    %121 = vector.shape_cast %120 : vector<1x1x128xf32> to vector<1x128xf32>
    %c0_58 = arith.constant 0 : index
    %c0_59 = arith.constant 0 : index
    %c0_60 = arith.constant 0 : index
    %122 = vector.load %arg17[%c0_58, %c0_59, %c0_60] : memref<1x1x128xf32, #tpu.memory_space<vmem>>, vector<1x1x128xf32>
    %123 = vector.shape_cast %122 : vector<1x1x128xf32> to vector<1x128xf32>
    %cst_61 = arith.constant dense<0.000000e+00> : vector<48xf32>
    %124 = vector.multi_reduction <add>, %119, %cst_61 [1] : vector<48x128xf32> to vector<48xf32>
    %125 = vector.shape_cast %124 : vector<48xf32> to vector<48x1xf32>
    %cst_62 = arith.constant 1.280000e+02 : f32
    %126 = vector.broadcast %cst_62 : f32 to vector<48x1xf32>
    %127 = arith.divf %125, %126 : vector<48x1xf32>
    %128 = vector.broadcast %127 : vector<48x1xf32> to vector<48x128xf32>
    %129 = arith.subf %119, %128 : vector<48x128xf32>
    %130 = arith.mulf %129, %129 : vector<48x128xf32>
    %cst_63 = arith.constant dense<0.000000e+00> : vector<48xf32>
    %131 = vector.multi_reduction <add>, %130, %cst_63 [1] : vector<48x128xf32> to vector<48xf32>
    %132 = vector.shape_cast %131 : vector<48xf32> to vector<48x1xf32>
    %cst_64 = arith.constant 1.280000e+02 : f32
    %133 = vector.broadcast %cst_64 : f32 to vector<48x1xf32>
    %134 = arith.divf %132, %133 : vector<48x1xf32>
    %cst_65 = arith.constant 9.99999996E-13 : f32
    %135 = vector.broadcast %cst_65 : f32 to vector<48x1xf32>
    %136 = arith.addf %134, %135 : vector<48x1xf32>
    %137 = math.rsqrt %136 : vector<48x1xf32>
    %138 = vector.broadcast %137 : vector<48x1xf32> to vector<48x128xf32>
    %139 = arith.mulf %129, %138 : vector<48x128xf32>
    %140 = vector.broadcast %121 : vector<1x128xf32> to vector<48x128xf32>
    %141 = arith.mulf %139, %140 : vector<48x128xf32>
    %142 = vector.broadcast %123 : vector<1x128xf32> to vector<48x128xf32>
    %143 = arith.addf %141, %142 : vector<48x128xf32>
    %c0_66 = arith.constant 0 : index
    %c0_67 = arith.constant 0 : index
    %144 = vector.load %arg23[%c0_66, %c0_67] : memref<48x128xf32, #tpu.memory_space<vmem>>, vector<48x128xf32>
    tpu.vector_store %arg23[%c0_66, %c0_67], %143 {strides = array<i32>} : memref<48x128xf32, #tpu.memory_space<vmem>>, vector<48x128xf32>,
    %c1_i32 = arith.constant 1 : i32
    %145 = arith.cmpi eq, %arg1, %c1_i32 : i32
    %146 = arith.extui %145 : i1 to i32
    %c0_i32_68 = arith.constant 0 : i32
    %147 = arith.cmpi ne, %146, %c0_i32_68 : i32
    scf.if %147 {
      %c0_69 = arith.constant 0 : index
      %c0_70 = arith.constant 0 : index
      %148 = vector.load %arg20[%c0_69, %c0_70] : memref<12x48xbf16, #tpu.memory_space<vmem>>, vector<12x48xbf16>
      %149 = arith.truncf %143 : vector<48x128xf32> to vector<48x128xbf16>
      %cst_71 = arith.constant dense<0.000000e+00> : vector<12x128xf32>
      %150 = tpu.matmul %148, %149, %cst_71 {dimension_numbers = #tpu.dot_dimension_numbers<[1], [0], [0], [1], [0, 0, 1, 1], [], []>} : vector<12x48xbf16>, vector<48x128xbf16>, vector<12x128xf32> -> vector<12x128xf32>
      %151 = arith.truncf %150 : vector<12x128xf32> to vector<12x128xbf16>
      %c0_72 = arith.constant 0 : index
      %c0_73 = arith.constant 0 : index
      %152 = vector.load %arg18[%c0_72, %c0_73] : memref<128x2xbf16, #tpu.memory_space<vmem>>, vector<128x2xbf16>
      %cst_74 = arith.constant dense<0.000000e+00> : vector<12x2xf32>
      %153 = tpu.matmul %151, %152, %cst_74 {dimension_numbers = #tpu.dot_dimension_numbers<[1], [0], [0], [1], [0, 0, 1, 1], [], []>} : vector<12x128xbf16>, vector<128x2xbf16>, vector<12x2xf32> -> vector<12x2xf32>
      %c0_75 = arith.constant 0 : index
      %c0_76 = arith.constant 0 : index
      %154 = vector.load %arg19[%c0_75, %c0_76] : memref<1x2xf32, #tpu.memory_space<vmem>>, vector<1x2xf32>
      %155 = vector.broadcast %154 : vector<1x2xf32> to vector<12x2xf32>
      %156 = arith.addf %153, %155 : vector<12x2xf32>
      %157 = vector.extract_strided_slice %156 {offsets = [0, 0], sizes = [6, 1], strides = [1, 1]} : vector<12x2xf32> to vector<6x1xf32>
      %cst_77 = arith.constant dense<0xFF800000> : vector<1xf32>
      %158 = vector.multi_reduction <maximumf>, %157, %cst_77 [0] : vector<6x1xf32> to vector<1xf32>
      %159 = vector.shape_cast %158 : vector<1xf32> to vector<1x1xf32>
      %160 = vector.broadcast %159 : vector<1x1xf32> to vector<6x1xf32>
      %161 = arith.subf %157, %160 : vector<6x1xf32>
      %162 = math.exp %161 : vector<6x1xf32>
      %cst_78 = arith.constant dense<0.000000e+00> : vector<1xf32>
      %163 = vector.multi_reduction <add>, %162, %cst_78 [0] : vector<6x1xf32> to vector<1xf32>
      %164 = vector.shape_cast %163 : vector<1xf32> to vector<1x1xf32>
      %165 = math.log %164 : vector<1x1xf32>
      %166 = vector.broadcast %165 : vector<1x1xf32> to vector<6x1xf32>
      %167 = arith.subf %161, %166 : vector<6x1xf32>
      %c0_79 = arith.constant 0 : index
      %c0_80 = arith.constant 0 : index
      %c0_81 = arith.constant 0 : index
      %168 = vector.load %arg21[%c0_79, %c0_80, %c0_81] : memref<1x6x1xf32, #tpu.memory_space<vmem>>, vector<1x6x1xf32>
      %169 = vector.shape_cast %168 : vector<1x6x1xf32> to vector<6x1xf32>
      %170 = vector.shape_cast %167 : vector<6x1xf32> to vector<1x6x1xf32>
      tpu.vector_store %arg21[%c0_79, %c0_80, %c0_81], %170 {strides = array<i32>} : memref<1x6x1xf32, #tpu.memory_space<vmem>>, vector<1x6x1xf32>,
      %171 = vector.extract_strided_slice %156 {offsets = [6, 1], sizes = [6, 1], strides = [1, 1]} : vector<12x2xf32> to vector<6x1xf32>
      %cst_82 = arith.constant dense<0xFF800000> : vector<1xf32>
      %172 = vector.multi_reduction <maximumf>, %171, %cst_82 [0] : vector<6x1xf32> to vector<1xf32>
      %173 = vector.shape_cast %172 : vector<1xf32> to vector<1x1xf32>
      %174 = vector.broadcast %173 : vector<1x1xf32> to vector<6x1xf32>
      %175 = arith.subf %171, %174 : vector<6x1xf32>
      %176 = math.exp %175 : vector<6x1xf32>
      %cst_83 = arith.constant dense<0.000000e+00> : vector<1xf32>
      %177 = vector.multi_reduction <add>, %176, %cst_83 [0] : vector<6x1xf32> to vector<1xf32>
      %178 = vector.shape_cast %177 : vector<1xf32> to vector<1x1xf32>
      %179 = math.log %178 : vector<1x1xf32>
      %180 = vector.broadcast %179 : vector<1x1xf32> to vector<6x1xf32>
      %181 = arith.subf %175, %180 : vector<6x1xf32>
      %c0_84 = arith.constant 0 : index
      %c0_85 = arith.constant 0 : index
      %c0_86 = arith.constant 0 : index
      %182 = vector.load %arg22[%c0_84, %c0_85, %c0_86] : memref<1x6x1xf32, #tpu.memory_space<vmem>>, vector<1x6x1xf32>
      %183 = vector.shape_cast %182 : vector<1x6x1xf32> to vector<6x1xf32>
      %184 = vector.shape_cast %181 : vector<6x1xf32> to vector<1x6x1xf32>
      tpu.vector_store %arg22[%c0_84, %c0_85, %c0_86], %184 {strides = array<i32>} : memref<1x6x1xf32, #tpu.memory_space<vmem>>, vector<1x6x1xf32>,
    } else {
    }
    return
  }
  func.func @transform_0(%arg0: i32, %arg1: i32) -> (i32, i32, i32) {
    %c0_i32 = arith.constant 0 : i32
    %c0_i32_0 = arith.constant 0 : i32
    %c0_i32_1 = arith.constant 0 : i32
    return %arg0, %c0_i32, %c0_i32_0 : i32, i32, i32
  }
  func.func @transform_1(%arg0: i32, %arg1: i32) -> (i32, i32, i32) {
    %c0_i32 = arith.constant 0 : i32
    %c0_i32_0 = arith.constant 0 : i32
    %c0_i32_1 = arith.constant 0 : i32
    return %arg0, %c0_i32, %c0_i32_0 : i32, i32, i32
  }
  func.func @transform_2(%arg0: i32, %arg1: i32) -> (i32, i32) {
    %c0_i32 = arith.constant 0 : i32
    %c0_i32_0 = arith.constant 0 : i32
    %c0_i32_1 = arith.constant 0 : i32
    return %c0_i32, %c0_i32_0 : i32, i32
  }
  func.func @transform_3(%arg0: i32, %arg1: i32) -> (i32, i32) {
    %c0_i32 = arith.constant 0 : i32
    %c0_i32_0 = arith.constant 0 : i32
    %c0_i32_1 = arith.constant 0 : i32
    return %c0_i32, %c0_i32_0 : i32, i32
  }
  func.func @transform_4(%arg0: i32, %arg1: i32) -> (i32, i32, i32) {
    %c0_i32 = arith.constant 0 : i32
    %c0_i32_0 = arith.constant 0 : i32
    %c0_i32_1 = arith.constant 0 : i32
    return %arg1, %c0_i32, %c0_i32_0 : i32, i32, i32
  }
  func.func @transform_5(%arg0: i32, %arg1: i32) -> (i32, i32, i32) {
    %c0_i32 = arith.constant 0 : i32
    %c0_i32_0 = arith.constant 0 : i32
    %c0_i32_1 = arith.constant 0 : i32
    return %arg1, %c0_i32, %c0_i32_0 : i32, i32, i32
  }
  func.func @transform_6(%arg0: i32, %arg1: i32) -> (i32, i32, i32) {
    %c0_i32 = arith.constant 0 : i32
    %c0_i32_0 = arith.constant 0 : i32
    %c0_i32_1 = arith.constant 0 : i32
    return %arg1, %c0_i32, %c0_i32_0 : i32, i32, i32
  }
  func.func @transform_7(%arg0: i32, %arg1: i32) -> (i32, i32, i32) {
    %c0_i32 = arith.constant 0 : i32
    %c0_i32_0 = arith.constant 0 : i32
    %c0_i32_1 = arith.constant 0 : i32
    return %arg1, %c0_i32, %c0_i32_0 : i32, i32, i32
  }
  func.func @transform_8(%arg0: i32, %arg1: i32) -> (i32, i32, i32) {
    %c0_i32 = arith.constant 0 : i32
    %c0_i32_0 = arith.constant 0 : i32
    %c0_i32_1 = arith.constant 0 : i32
    return %arg1, %c0_i32, %c0_i32_0 : i32, i32, i32
  }
  func.func @transform_9(%arg0: i32, %arg1: i32) -> (i32, i32, i32) {
    %c0_i32 = arith.constant 0 : i32
    %c0_i32_0 = arith.constant 0 : i32
    %c0_i32_1 = arith.constant 0 : i32
    return %arg1, %c0_i32, %c0_i32_0 : i32, i32, i32
  }
  func.func @transform_10(%arg0: i32, %arg1: i32) -> (i32, i32, i32) {
    %c0_i32 = arith.constant 0 : i32
    %c0_i32_0 = arith.constant 0 : i32
    %c0_i32_1 = arith.constant 0 : i32
    return %arg1, %c0_i32, %c0_i32_0 : i32, i32, i32
  }
  func.func @transform_11(%arg0: i32, %arg1: i32) -> (i32, i32, i32) {
    %c0_i32 = arith.constant 0 : i32
    %c0_i32_0 = arith.constant 0 : i32
    %c0_i32_1 = arith.constant 0 : i32
    return %arg1, %c0_i32, %c0_i32_0 : i32, i32, i32
  }
  func.func @transform_12(%arg0: i32, %arg1: i32) -> (i32, i32, i32) {
    %c0_i32 = arith.constant 0 : i32
    %c0_i32_0 = arith.constant 0 : i32
    %c0_i32_1 = arith.constant 0 : i32
    return %arg1, %c0_i32, %c0_i32_0 : i32, i32, i32
  }
  func.func @transform_13(%arg0: i32, %arg1: i32) -> (i32, i32, i32) {
    %c0_i32 = arith.constant 0 : i32
    %c0_i32_0 = arith.constant 0 : i32
    %c0_i32_1 = arith.constant 0 : i32
    return %arg1, %c0_i32, %c0_i32_0 : i32, i32, i32
  }
  func.func @transform_14(%arg0: i32, %arg1: i32) -> (i32, i32, i32) {
    %c0_i32 = arith.constant 0 : i32
    %c0_i32_0 = arith.constant 0 : i32
    %c0_i32_1 = arith.constant 0 : i32
    return %arg1, %c0_i32, %c0_i32_0 : i32, i32, i32
  }
  func.func @transform_15(%arg0: i32, %arg1: i32) -> (i32, i32, i32) {
    %c0_i32 = arith.constant 0 : i32
    %c0_i32_0 = arith.constant 0 : i32
    %c0_i32_1 = arith.constant 0 : i32
    return %arg1, %c0_i32, %c0_i32_0 : i32, i32, i32
  }
  func.func @transform_16(%arg0: i32, %arg1: i32) -> (i32, i32) {
    %c0_i32 = arith.constant 0 : i32
    %c0_i32_0 = arith.constant 0 : i32
    %c0_i32_1 = arith.constant 0 : i32
    return %c0_i32, %c0_i32_0 : i32, i32
  }
  func.func @transform_17(%arg0: i32, %arg1: i32) -> (i32, i32) {
    %c0_i32 = arith.constant 0 : i32
    %c0_i32_0 = arith.constant 0 : i32
    %c0_i32_1 = arith.constant 0 : i32
    return %c0_i32, %c0_i32_0 : i32, i32
  }
  func.func @transform_18(%arg0: i32, %arg1: i32) -> (i32, i32) {
    %c0_i32 = arith.constant 0 : i32
    %c0_i32_0 = arith.constant 0 : i32
    %c0_i32_1 = arith.constant 0 : i32
    return %c0_i32, %c0_i32_0 : i32, i32
  }
  func.func @transform_19(%arg0: i32, %arg1: i32) -> (i32, i32, i32) {
    %c0_i32 = arith.constant 0 : i32
    %c0_i32_0 = arith.constant 0 : i32
    %c0_i32_1 = arith.constant 0 : i32
    return %arg0, %c0_i32, %c0_i32_0 : i32, i32, i32
  }
  func.func @transform_20(%arg0: i32, %arg1: i32) -> (i32, i32, i32) {
    %c0_i32 = arith.constant 0 : i32
    %c0_i32_0 = arith.constant 0 : i32
    %c0_i32_1 = arith.constant 0 : i32
    return %arg0, %c0_i32, %c0_i32_0 : i32, i32, i32
  }
}

</mosaic_0001>

<bundles_post_ra>
// kernel: tpu_custom_call.1
= control target key start
LH: loop header
LB: loop body
LE: loop exit
PB: predicated region body
PF: predicated region fallthrough
CT: control target
= control target key end

     0   :  { %s5015_s0 = inlined_call_operand.hbm [shape: f32[2,48,128], index: 0, kind: input, shape index: {}]   ;;  %s5016_s1 = inlined_call_operand.vmem [shape: f32[2,1,48], index: 1, kind: input, shape index: {}]   ;;  %s5017_s2 = inlined_call_operand.vmem [shape: f32[1,128], index: 2, kind: input, shape index: {}]   ;;  %s5018_s3 = inlined_call_operand.vmem [shape: f32[1,128], index: 3, kind: input, shape index: {}]   ;;  %s5019_s4 = inlined_call_operand.hbm [shape: bf16[2,128,384], index: 4, kind: input, shape index: {}]   ;;  %s5020_s5 = inlined_call_operand.vmem [shape: f32[2,1,384], index: 5, kind: input, shape index: {}]   ;;  %s5021_s6 = inlined_call_operand.hbm [shape: bf16[2,128,128], index: 6, kind: input, shape index: {}]   ;;  %s5022_s7 = inlined_call_operand.vmem [shape: f32[2,1,128], index: 7, kind: input, shape index: {}]   ;;  %s5023_s8 = inlined_call_operand.vmem [shape: f32[2,1,128], index: 8, kind: input, shape index: {}]   ;;  %s5024_s9 = inlined_call_operand.vmem [shape: f32[2,1,128], index: 9, kind: input, shape index: {}]   ;;  %s5025_s10 = inlined_call_operand.hbm [shape: bf16[2,128,256], index: 10, kind: input, shape index: {}]   ;;  %s5026_s11 = inlined_call_operand.vmem [shape: f32[2,1,256], index: 11, kind: input, shape index: {}]   ;;  %s5027_s12 = inlined_call_operand.hbm [shape: bf16[2,256,128], index: 12, kind: input, shape index: {}]   ;;  %s5028_s13 = inlined_call_operand.vmem [shape: f32[2,1,128], index: 13, kind: input, shape index: {}]   ;;  %s5029_s14 = inlined_call_operand.vmem [shape: f32[2,1,128], index: 14, kind: input, shape index: {}]   ;;  %s5030_s15 = inlined_call_operand.vmem [shape: f32[2,1,128], index: 15, kind: input, shape index: {}]   ;;  %s5031_s16 = inlined_call_operand.vmem [shape: bf16[128,2], index: 16, kind: input, shape index: {}]   ;;  %s5032_s17 = inlined_call_operand.vmem [shape: f32[1,2], index: 17, kind: input, shape index: {}]   ;;  %s5033_s18 = inlined_call_operand.vmem [shape: bf16[12,48], index: 18, kind: input, shape index: {}]   ;;  %s5034_s19 = inlined_call_operand.vmem [shape: f32[2,6,1], index: 19, kind: output, shape index: {0}]   ;;  %s5035_s20 = inlined_call_operand.vmem [shape: f32[2,6,1], index: 20, kind: output, shape index: {1}]  }
   0x1   :  { %5052 = sst [smem:[#allocation27_spill]] %s5015_s0 }
   0x2   :  { %5053 = sst [smem:[#allocation28_spill]] %s5016_s1 }
   0x3   :  { %5054 = sst [smem:[#allocation29_spill]] %s5017_s2 }
   0x4   :  { %5055 = sst [smem:[#allocation30_spill]] %s5018_s3 }
   0x5   :  { %5056 = sst [smem:[#allocation31_spill]] %s5019_s4 }
   0x6   :  { %5057 = sst [smem:[#allocation32_spill]] %s5020_s5 }
   0x7   :  { %5058 = sst [smem:[#allocation33_spill]] %s5021_s6 }
   0x8   :  { %5059 = sst [smem:[#allocation34_spill]] %s5022_s7 }
   0x9   :  { %5060 = sst [smem:[#allocation35_spill]] %s5023_s8 }
   0xa   :  { %5061 = sst [smem:[#allocation36_spill]] %s5024_s9 }
   0xb   :  { %5062 = sst [smem:[#allocation37_spill]] %s5025_s10 }
   0xc   :  { %5063 = sst [smem:[#allocation38_spill]] %s5026_s11 }
   0xd   :  { %5064 = sst [smem:[#allocation39_spill]] %s5027_s12 }
   0xe   :  { %5065 = sst [smem:[#allocation40_spill]] %s5028_s13 }
   0xf   :  { %5066 = sst [smem:[#allocation41_spill]] %s5029_s14 }
  0x10   :  { %5067 = sst [smem:[#allocation42_spill]] %s5030_s15 }
  0x11   :  { %5068 = sst [smem:[#allocation43_spill]] %s5031_s16 }
  0x12   :  { %5069 = sst [smem:[#allocation44_spill]] %s5032_s17 }
  0x13   :  { %5070 = sst [smem:[#allocation45_spill]] %s5033_s18 }
  0x14   :  { %5071 = sst [smem:[#allocation46_spill]] %s5034_s19 }
  0x15   :  { %5072 = sst [smem:[#allocation47_spill]] %s5035_s20 }
  0x16   :  { %26 = vsyncpa [#allocation4], 0 }
  0x17   :  { %28 = vsyncpa [#allocation4 + $0x1], 0 }
  0x18   :  { %29 = vsyncpa [#allocation6], 0 }
  0x19   :  { %31 = vsyncpa [#allocation6 + $0x1], 0 }
  0x1a   :  { %32 = vsyncpa [#allocation9], 0 }
  0x1b   :  { %34 = vsyncpa [#allocation9 + $0x1], 0  ;;  %s4105_s1 = smov 0   ;;  %s4107_s22 = smov 0  }
  0x1c   :  { %s4109_s23 = smov 0   ;;  %s4111_s24 = smov 0  }
  0x1d   :  { %s4113_s2 = smov 0   ;;  %s4115_s25 = smov 0  }
  0x1e   :  { %s4117_s3 = smov 0   ;;  %s4119_s26 = smov 0  }
  0x1f   :  { %s4121_s27 = smov 0   ;;  %s4123_s28 = smov 0  }
  0x20   :  { %s4125_s4 = smov 0  }
  0x21 LB: > { %5073 = sst [smem:[#allocation14_spill]] %s3952_s22  ;;  %s49_s29 = sadd.s32 1, %s3980_s27  ;;  %s3988_s4 = sphi %s4125_s4, %s40_s4   ;;  %s3984_s28 = sphi %s4123_s28, %s5139_s28   ;;  %s3980_s27 = sphi %s4121_s27, %s5138_s27   ;;  %s3976_s26 = sphi %s4119_s26, %s5137_s26   ;;  %s3972_s3 = sphi %s4117_s3, %s5136_s3   ;;  %s3968_s25 = sphi %s4115_s25, %s5135_s25   ;;  %s3964_s2 = sphi %s4113_s2, %s5134_s2   ;;  %s3960_s24 = sphi %s4111_s24, %s5133_s24   ;;  %s3956_s23 = sphi %s4109_s23, %s5132_s23   ;;  %s3952_s22 = sphi %s4107_s22, %s5131_s22   ;;  %s3948_s1 = sphi %s4105_s1, %s5130_s1  }
  0x22   : > { %5074 = sst [smem:[#allocation15_spill]] %s3956_s23  ;;  %p67_p0 = scmp.eq.s32.totalorder %s3988_s4, 0 }
  0x23   : > { %5075 = sst [smem:[#allocation16_spill]] %s3964_s2  ;;  %p4162_p1 = scmp.ge.s32.totalorder %s49_s29, 2 }
  0x24   : > { %5076 = sst [smem:[#allocation17_spill]] %s3968_s25  ;;  %s153_s0 = sadd.s32 1, %s3956_s23 }
  0x25   : > { %5077 = sst [smem:[#allocation18_spill]] %s3972_s3  ;;  %p160_p2 = scmp.ne.s32.totalorder %s3956_s23, %s3952_s22 }
  0x26   : > { %5078 = sst [smem:[#allocation19_spill]] %s3976_s26  ;;  %p166_p3 = scmp.ne.s32.totalorder %s3952_s22, %s3948_s1 }
  0x27   : > { %5079 = sst [smem:[#allocation20_spill]] %s3980_s27  ;;  %s5141_s29 = smov (%p4162_p1, %s49_s29), 0 }
  0x28   : > { %5080 = sst [smem:[#allocation21_spill]] %s3984_s28  ;;  %p162_p4 = por %p160_p2, %p67_p0 }
  0x29   : > { %5081 = sst [smem:[#allocation22_spill]] %s3988_s4  ;;  %s150_s21 = ssub.s32 %s3980_s27, %s5141_s29 }
  0x2a   : > { %5083 = sst [smem:[#allocation23_spill]] %s5141_s29  ;;  %p3494_p5 = scmp.lt.s32.totalorder %s3988_s4, 4 }
  0x2b   : > { %p151_p6 = scmp.eq.s32.totalorder %s150_s21, 0  ;;  %s634_s17 = sand.u32 1, %s3988_s4  }
  0x2c   : > { %s4182_s18 = sand.u32 1, %s3956_s23   ;;  %p4190_p7 = pnand %p3494_p5, %p162_p4 }
  0x2d   : > { %s4185_s16 = scalar_select %p151_p6, %s3956_s23, %s153_s0  }
  0x2e   : > { %s3463_s20 = smul.u32 192, %s4182_s18  ;;  %s5086_s14 = sld [smem:[#allocation31_spill]] }
  0x2f   : > { %5084 = sst [smem:[#allocation24_spill]] %s4185_s16  ;;  %s3464_s29 = smul.u32 192, %s3980_s27 }
  0x30   : > { %s638_s11 = scalar_lea.vmem [#allocation5], %s3463_s20  ;;  %s4198_s0 = scalar_lea.sflag [#allocation6], %s634_s17 }
  0x31   : > { %s646_s5 = sshll.u32 %s638_s11, 4  ;;  %s3990_s16 = smov 192   ;;  %s647_s5 = int_to_ptr.vmem [resolvable:$true] %s646_s5 }
  0x32   : > { %s3991_s23 = smov 12   ;;  %p3069_p8 = scmp.ge.s32.totalorder %s3988_s4, 1 }
  0x33   : > { %p770_p9 = scmp.lt.s32.totalorder %s3988_s4, 5  ;;  %s3386_s15 = sshll.u32 %s3980_s27, 7 }
  0x34   : > { %s643_s13 = scalar_lea.hbm %s5086_s14, %s3464_s29  ;;  %s3063_s14 = sshll.u32 %s4182_s18, 7 }
  0x35   : > { %s644_s9 = sshll.u32 %s643_s13, 4  ;;  %p4205_p10 = pnand %p3069_p8, %p770_p9  ;;  %s645_s9 = int_to_ptr.hbm [resolvable:$true] %s644_s9 }
  0x36   : > { %3484 = dma.hbm_to_vmem [thread:$0]  (!%p4190_p7), %s645_s9, 3072, %s647_s5, %s4198_s0, %s3990_s16, %s3990_s16, %s3991_s23  }
  0x37   : > { %s5088_s10 = sld [smem:[#allocation37_spill]]  ;;  %s707_s21 = scalar_lea.vmem [#allocation8], %s3063_s14 }
  0x38   : > { %s715_s7 = sshll.u32 %s707_s21, 4  ;;  %s4214_s5 = scalar_lea.sflag [#allocation9], %s634_s17  ;;  %s716_s7 = int_to_ptr.vmem [resolvable:$true] %s715_s7 }
  0x39   : > { %s5042_s9 = smov 128   ;;  %s5043_s16 = smov 8  }
  0x3a   : > { %s5089_s12 = sld [smem:[#allocation39_spill]]  ;;  %s736_s17 = scalar_lea.vmem [#allocation10], %s3063_s14 }
  0x3b   : > { %s744_s21 = sshll.u32 %s736_s17, 4  ;;  %s52_s3 = sadd.s32 1, %s3984_s28  ;;  %s4227_s21 = int_to_ptr.vmem [resolvable:$true] %s744_s21 }
  0x3c   : > { %s5143_s3 = smov (!%p4162_p1, %s52_s3), %s3984_s28  ;;  %p66_p11 = scmp.ne.s32.totalorder %s3968_s25, %s3964_s2 }
  0x3d   : > { %s712_s20 = scalar_lea.hbm %s5088_s10, %s3386_s15  ;;  %s5041_s10 = sadd.s32 4294967295, %s3988_s4  }
  0x3e   : > { %s713_s29 = sshll.u32 %s712_s20, 4  ;;  %p54_p12 = scmp.ge.s32.totalorder %s5143_s3, 2  ;;  %s714_s29 = int_to_ptr.hbm [resolvable:$true] %s713_s29 }
  0x3f   : > { %3490 = dma.hbm_to_vmem [thread:$0]  (!%p4190_p7), %s714_s29, 2048, %s716_s7, %s4214_s5, %s5042_s9, %s5042_s9, %s5043_s16  }
  0x40   : > { %s741_s13 = scalar_lea.hbm %s5089_s12, %s3386_s15  ;;  %s59_s7 = sadd.s32 1, %s3968_s25 }
  0x41   : > { %s742_s20 = sshll.u32 %s741_s13, 4  ;;  %p72_p13 = scmp.ne.s32.totalorder %s3964_s2, %s3960_s24  ;;  %s4225_s20 = int_to_ptr.hbm [resolvable:$true] %s742_s20 }
  0x42   : > { %p68_p2 = por %p67_p0, %p66_p11  ;;  %p73_p4 = scmp.eq.s32.totalorder %s5041_s10, 0 }
  0x43   : > { %s5145_s3 = smov (%p54_p12, %s5143_s3), 0  ;;  %s606_s24 = sand.u32 1, %s3968_s25  }
  0x44   : > { %5090 = sst [smem:[#allocation25_spill]] %s5145_s3  ;;  %p4245_p6 = por %p73_p4, %p72_p13 }
  0x45   : > { %p4252_p8 = por %p166_p3, %p73_p4  ;;  %s56_s15 = ssub.s32 %s3984_s28, %s5145_s3 }
  0x46   : > { %p57_p1 = scmp.eq.s32.totalorder %s56_s15, 0  ;;  %s3461_s29 = smul.u32 48, %s606_s24 }
  0x47   : > { %p3479_p0 = pnand %p3494_p5, %p68_p2  ;;  %s3462_s11 = smul.u32 48, %s3984_s28 }
  0x48   : > { %s4262_s23 = scalar_select %p57_p1, %s3968_s25, %s59_s7  }
  0x49   : > { %s610_s13 = scalar_lea.vmem [#allocation3], %s3461_s29  ;;  %s5094_s16 = sld [smem:[#allocation27_spill]] }
  0x4a   : > { %5093 = sst [smem:[#allocation26_spill]] %s4262_s23  ;;  %s618_s17 = sshll.u32 %s610_s13, 4  ;;  %s619_s17 = int_to_ptr.vmem [resolvable:$true] %s618_s17 }
  0x4b   : > { %s3060_s12 = sshll.u32 %s4182_s18, 6  ;;  %s607_s3 = scalar_lea.sflag [#allocation4], %s606_s24 }
  0x4c   : > { %s5095_s7 = smov 8   ;;  %s5096_s23 = smov 128  }
  0x4d   : > { %s3385_s29 = sshll.u32 %s3980_s27, 6  ;;  %s667_s13 = scalar_lea.vmem [#allocation7], %s3060_s12 }
  0x4e   : > { %s675_s28 = sshll.u32 %s667_s13, 4  ;;  %s5097_s6 = sld [smem:[#allocation33_spill]]  ;;  %s676_s28 = int_to_ptr.vmem [resolvable:$true] %s675_s28 }
  0x4f   : > { %s615_s1 = scalar_lea.hbm %s5094_s16, %s3462_s11  ;;  %s3994_s25 = smov 64  }
  0x50   : > { %s616_s15 = sshll.u32 %s615_s1, 4  ;;  %s3995_s26 = smov 4   ;;  %s617_s15 = int_to_ptr.hbm [resolvable:$true] %s616_s15 }
  0x51   : > { %3481 = dma.hbm_to_vmem [thread:$0]  (!%p3479_p0), %s617_s15, 768, %s619_s17, %s607_s3, %s5096_s23, %s5096_s23, %s5095_s7  }
  0x52   : > { %3493 = dma.hbm_to_vmem [thread:$0]  (!%p4190_p7), %s4225_s20, 2048, %s4227_s21, %s4214_s5, %s3994_s25, %s3994_s25, %s3995_s26  }
  0x53   : > { %774 = sbr.rel (%p4205_p10) target bundleno = 2924 (0xb6c), region = 96  ;;  %s776_s12 = sand.u32 (!%p4205_p10), 1, %s3964_s2  }
  0x54   : > { %s672_s16 = scalar_lea.hbm %s5097_s6, %s3385_s29  ;;  %s3465_s18 = smul.u32 (!%p4205_p10), 48, %s776_s12 }
  0x55   : > { %s673_s11 = sshll.u32 %s672_s16, 4  ;;  %s777_s3 = scalar_lea.sflag (!%p4205_p10), [#allocation4], %s776_s12  ;;  %s674_s11 = int_to_ptr.hbm [resolvable:$true] %s673_s11 }
  0x56   : > { %3487 = dma.hbm_to_vmem [thread:$0]  (!%p4190_p7), %s674_s11, 1024, %s676_s28, %s4198_s0, %s3994_s25, %s3994_s25, %s3995_s26  }
  0x57   : > { %s4287_s24 = scalar_lea.vmem (!%p4205_p10), [#allocation3], %s3465_s18 }
  0x58   : > { %3935 = dma.done.wait (%p4245_p6), %s777_s3, 768  }
  0x59   : > { %3937 = vsyncadd (%p4245_p6), %s777_s3, 4294966528  ;;  %s5098_s23 = sadd.s32 4294967295, %s3988_s4   ;;  %s4296_s25 = sand.u32 1, %s3952_s22  }
  0x5a   : > { %s786_s19 = sand.u32 1, %s5098_s23   ;;  %s3466_s8 = smul.u32 192, %s4296_s25 }
  0x5b   : > { %s787_s26 = scalar_lea.sflag [#allocation6], %s786_s19 }
  0x5c   : > { %s4299_s28 = scalar_lea.vmem [#allocation5], %s3466_s8 }
  0x5d   : > { %3939 = dma.done.wait (%p4252_p8), %s787_s26, 4096  }
  0x5e   : > { %3941 = vsyncadd (%p4252_p8), %s787_s26, 4294963200  ;;  %s3070_s0 = sshll.u32 %s4296_s25, 6  ;;  %s3071_s5 = sshll.u32 %s4296_s25, 7 }
  0x5f   : > { %s4307_s20 = scalar_lea.vmem [#allocation7], %s3070_s0  ;;  %s807_s21 = scalar_lea.sflag [#allocation9], %s786_s19 }
  0x60   : > { %s4309_s14 = scalar_lea.vmem [#allocation8], %s3071_s5 }
  0x61   : > { %3943 = dma.done.wait (%p4252_p8), %s807_s21, 4096  }
  0x62   : > { %3945 = vsyncadd (%p4252_p8), %s807_s21, 4294963200  ;;  %s5099_s17 = sld [smem:[#allocation19_spill]]  ;;  %s4374_s16 = scalar_lea.vmem [#allocation10], %s3071_s5 }
  0x63   : > { %s5100_s1 = sld [smem:[#allocation18_spill]] }
  0x64   : > { %s5105_s6 = sld [smem:[#allocation32_spill]] }
  0x65   : > { %s5106_s22 = sld [smem:[#allocation38_spill]] }
  0x66   : > { %s5107_s12 = sld [smem:[#allocation40_spill]] }
  0x67   : > { %s5108_s25 = sld [smem:[#allocation41_spill]] }
  0x68   : > { %p930_p3 = scmp.lt.s32.totalorder %s5099_s17, 1  ;;  %s5109_s21 = sld [smem:[#allocation42_spill]] }
  0x69   : > { %p933_p5 = scmp.lt.s32.totalorder %s5100_s1, 1  ;;  %s5110_s29 = sld [smem:[#allocation46_spill]] }
  0x6a   : > { %s5147_s17 = smov (!%p930_p3, %s5099_s17), 1  ;;  %s5111_s30 = sld [smem:[#allocation47_spill]] }
  0x6b   : > { %s4321_s15 = scalar_select %p933_p5, %s5100_s1, 1 }
  0x6c   : > { %s3074_s10 = sshll.u32 %s5147_s17, 3  ;;  %p3076_p7 = scmp.ne.s32.totalorder %s5100_s1, 0 }
  0x6d   : > { %s3467_s9 = smul.u32 3, %s4321_s15  ;;  %s3073_s13 = sshll.u32 %s4321_s15, 1 }
  0x6e   : > { %s4350_s4 = scalar_lea.vmem %s5106_s22, %s3073_s13  ;;  %s952_s3 = scalar_lea.vmem %s5107_s12, %s4321_s15 }
  0x6f   : > { %s4344_s27 = scalar_lea.vmem %s5105_s6, %s3467_s9  ;;  %s955_s8 = scalar_lea.vmem %s5108_s25, %s4321_s15 }
  0x70   : > { %s958_s7 = scalar_lea.vmem %s5109_s21, %s4321_s15  ;;  %s4367_s18 = scalar_lea.vmem %s5110_s29, %s3074_s10 }
  0x71   : > { %s4372_s13 = scalar_lea.vmem %s5111_s30, %s3074_s10  ;;  %971 = sbr.rel (%p3076_p7) target bundleno = 403 (0x193), region = 120 }
  0x72   : > { %s5112_s1 = sld [smem:[#allocation29_spill]] (!%p3076_p7) }
  0x73   : > { %s5113_s21 = sld [smem:[#allocation30_spill]] (!%p3076_p7) }
  0x76   : > { %v976_v0 = vld [vmem:[%s4287_s24 + $0x20] sm:$0xff]  ;;  %v974_v1 = vld [vmem:[%s4287_s24 + $0x10] sm:$0xff]  ;;  %v977_v3 = vld [vmem:[%s4287_s24 + $0x28] sm:$0xff]  ;;  %v3996_v6 = vmov 128.0  }
  0x77   : > { %v972_v2 = vld [vmem:[%s4287_s24] sm:$0xff]  ;;  %988 = vadd.xlane.f32.xlu2 %v976_v0  ;;  %984 = vadd.xlane.f32.xlu1 %v974_v1  ;;  %v975_v4 = vld [vmem:[%s4287_s24 + $0x18] sm:$0xff]  ;;  %v973_v5 = vld [vmem:[%s4287_s24 + $0x8] sm:$0xff]  ;;  %3595 = vrcp.f32 %v3996_v6 }
  0x78   : > { %980 = vadd.xlane.f32.xlu0 %v972_v2  ;;  %v4432_v6 = vld [vmem:[%s5112_s1] ss:$0 sm:$0xff] }
  0x7d   : > { %v3596_v7 = vpop.eup %3595 }
  0x7e   : > { %v993_v8 = vmul.f32 128.0, %v3596_v7  ;;  %vm997_vm0 = vweird.f32 %v3596_v7 }
  0x7f   : > { %990 = vadd.xlane.f32.xlu2 %v977_v3  ;;  %986 = vadd.xlane.f32.xlu1 %v975_v4 }
  0x80   : > { %982 = vadd.xlane.f32.xlu0 %v973_v5  ;;  %v994_v9 = vsub.f32 1.0, %v993_v8 }
  0x82   : > { %v995_v10 = vmul.f32 %v3596_v7, %v994_v9 }
  0x84   : > { %v996_v11 = vadd.f32 %v3596_v7, %v995_v10 }
  0x86   : > { %v4383_v12 = vsel %vm997_vm0, %v3596_v7, %v996_v11 }
  0xea   : > { %v989_v13 = vpop.xlane.xlu2 %988  ;;  %v985_v14 = vpop.xlane.xlu1 %984 }
  0xeb   : > { %v1001_v15 = vmul.f32 %v4383_v12, %v985_v14  ;;  %v981_v16 = vpop.xlane.xlu0 %980  ;;  %v1003_v33 = vmul.f32 %v4383_v12, %v989_v13 }
  0xec   : > { %v999_v17 = vmul.f32 %v4383_v12, %v981_v16 }
  0xed   : > { %v4387_v18 = vsub.f32 %v974_v1, %v1001_v15  ;;  %v4411_v35 = vsub.f32 %v976_v0, %v1003_v33 }
  0xee   : > { %v4389_v19 = vsub.f32 %v972_v2, %v999_v17 }
  0xef   : > { %v1013_v20 = vmul.f32 %v4387_v18, %v4387_v18  ;;  %v1015_v36 = vmul.f32 %v4411_v35, %v4411_v35 }
  0xf0   : > { %v1011_v21 = vmul.f32 %v4389_v19, %v4389_v19 }
  0xf1   : > { %1021 = vadd.xlane.f32.xlu2 %v1013_v20 }
  0xf2   : > { %1017 = vadd.xlane.f32.xlu0 %v1011_v21  ;;  %v991_v22 = vpop.xlane.xlu2 %990  ;;  %v987_v23 = vpop.xlane.xlu1 %986 }
  0xf3   : > { %v1004_v24 = vmul.f32 %v4383_v12, %v991_v22  ;;  %v1002_v25 = vmul.f32 %v4383_v12, %v987_v23  ;;  %v983_v26 = vpop.xlane.xlu0 %982 }
  0xf4   : > { %v1000_v27 = vmul.f32 %v4383_v12, %v983_v26 }
  0xf5   : > { %v4398_v28 = vsub.f32 %v977_v3, %v1004_v24  ;;  %v4400_v29 = vsub.f32 %v975_v4, %v1002_v25 }
  0xf6   : > { %v4402_v30 = vsub.f32 %v973_v5, %v1000_v27 }
  0xf7   : > { %v1016_v31 = vmul.f32 %v4398_v28, %v4398_v28  ;;  %v1014_v32 = vmul.f32 %v4400_v29, %v4400_v29 }
  0xf8   : > { %v1012_v34 = vmul.f32 %v4402_v30, %v4402_v30 }
  0xf9   : > { %1027 = vadd.xlane.f32.xlu2 %v1016_v31 }
  0xfa   : > { %1023 = vadd.xlane.f32.xlu0 %v1014_v32  ;;  %1019 = vadd.xlane.f32.xlu1 %v1012_v34 }
 0x102   : > { %1025 = vadd.xlane.f32.xlu1 %v1015_v36 }
 0x164   : > { %v1022_v37 = vpop.xlane.xlu2 %1021 }
 0x165   : > { %v1031_v38 = vmul.f32 %v1022_v37, %v4383_v12  ;;  %v1018_v39 = vpop.xlane.xlu0 %1017 }
 0x166   : > { %v1029_v40 = vmul.f32 %v1018_v39, %v4383_v12 }
 0x167   : > { %v1037_v41 = vadd.f32 1e-12, %v1031_v38 }
 0x168   : > { %v1035_v42 = vadd.f32 1e-12, %v1029_v40 }
 0x169   : > { %3597 = vrsqrt.f32 %v1037_v41  ;;  %vm1067_vm1 = vweird.f32 %v1037_v41 }
 0x16a   : > { %3599 = vrsqrt.f32 %v1035_v42  ;;  %vm1047_vm5 = vweird.f32 %v1035_v42 }
 0x16c   : > { %v1028_v43 = vpop.xlane.xlu2 %1027 }
 0x16d   : > { %v1034_v44 = vmul.f32 %v1028_v43, %v4383_v12  ;;  %v1020_v45 = vpop.xlane.xlu1 %1019  ;;  %v1024_v46 = vpop.xlane.xlu0 %1023 }
 0x16e   : > { %v1030_v47 = vmul.f32 %v1020_v45, %v4383_v12  ;;  %v1032_v48 = vmul.f32 %v1024_v46, %v4383_v12 }
 0x16f   : > { %v3598_v49 = vpop.eup %3597  ;;  %v1040_v50 = vadd.f32 1e-12, %v1034_v44 }
 0x170   : > { %v3600_v51 = vpop.eup %3599  ;;  %v1062_v52 = vmul.f32 %v3598_v49, %v1037_v41  ;;  %v4420_v53 = vadd.f32 1e-12, %v1030_v47  ;;  %v4422_v54 = vadd.f32 1e-12, %v1032_v48  ;;  %vm1068_vm2 = vweird.f32 %v3598_v49 }
 0x171   : > { %v1042_v55 = vmul.f32 %v3600_v51, %v1035_v42  ;;  %3601 = vrsqrt.f32 %v1040_v50  ;;  %vm1048_vm3 = vweird.f32 %v3600_v51  ;;  %vm1069_vm4 = vmor %vm1067_vm1, %vm1068_vm2  ;;  %vm1097_vm7 = vweird.f32 %v1040_v50 }
 0x172   : > { %v1063_v56 = vmul.f32 %v3598_v49, %v1062_v52  ;;  %3603 = vrsqrt.f32 %v4420_v53  ;;  %vm1049_vm6 = vmor %vm1047_vm5, %vm1048_vm3  ;;  %vm1077_vm10 = vweird.f32 %v4422_v54  ;;  %vm1057_vm13 = vweird.f32 %v4420_v53 }
 0x173   : > { %v1043_v57 = vmul.f32 %v3600_v51, %v1042_v55  ;;  %3605 = vrsqrt.f32 %v4422_v54 }
 0x174   : > { %v1064_v58 = vmul.f32 0.5, %v1063_v56 }
 0x175   : > { %v1044_v59 = vmul.f32 0.5, %v1043_v57  ;;  %v1026_v60 = vpop.xlane.xlu1 %1025 }
 0x176   : > { %v1065_v61 = vsub.f32 1.5, %v1064_v58  ;;  %v1033_v62 = vmul.f32 %v1026_v60, %v4383_v12  ;;  %v3594_v12 = vld [vmem:[%s5113_s21] ss:$0 sm:$0xff] }
 0x177   : > { %v3602_v63 = vpop.eup %3601  ;;  %v1045_v0 = vsub.f32 1.5, %v1044_v59 }
 0x178   : > { %v3604_v1 = vpop.eup %3603  ;;  %v1066_v2 = vmul.f32 %v3598_v49, %v1065_v61  ;;  %v1092_v3 = vmul.f32 %v3602_v63, %v1040_v50  ;;  %v4427_v4 = vadd.f32 1e-12, %v1033_v62  ;;  %vm1098_vm8 = vweird.f32 %v3602_v63 }
 0x179   : > { %v3606_v5 = vpop.eup %3605  ;;  %v1046_v7 = vmul.f32 %v3600_v51, %v1045_v0  ;;  %v1052_v8 = vmul.f32 %v3604_v1, %v4420_v53  ;;  %vm1058_vm9 = vweird.f32 %v3604_v1  ;;  %vm1099_vm12 = vmor %vm1097_vm7, %vm1098_vm8 }
 0x17a   : > { %v1070_v9 = vsel %vm1069_vm4, %v3598_v49, %v1066_v2  ;;  %v1093_v10 = vmul.f32 %v3602_v63, %v1092_v3  ;;  %v1072_v11 = vmul.f32 %v3606_v5, %v4422_v54  ;;  %3607 = vrsqrt.f32 %v4427_v4  ;;  %vm1059_vm14 = vmor %vm1057_vm13, %vm1058_vm9 }
 0x17b   : > { %v1103_v13 = vmul.f32 %v1070_v9, %v4387_v18  ;;  %v1050_v14 = vsel %vm1049_vm6, %v3600_v51, %v1046_v7  ;;  %v1053_v15 = vmul.f32 %v3604_v1, %v1052_v8  ;;  %vm1078_vm11 = vweird.f32 %v3606_v5 }
 0x17c   : > { %v1101_v16 = vmul.f32 %v1050_v14, %v4389_v19  ;;  %v1094_v17 = vmul.f32 0.5, %v1093_v10  ;;  %v1073_v20 = vmul.f32 %v3606_v5, %v1072_v11  ;;  %vm1079_vm15 = vmor %vm1077_vm10, %vm1078_vm11  ;;  %vm1087_vm1 = vweird.f32 %v4427_v4 }
 0x17d   : > { %v1112_v21 = vmul.f32 %v4432_v6, %v1103_v13  ;;  %v1054_v22 = vmul.f32 0.5, %v1053_v15 }
 0x17e   : > { %v1110_v23 = vmul.f32 %v4432_v6, %v1101_v16  ;;  %v1095_v24 = vsub.f32 1.5, %v1094_v17  ;;  %v1074_v25 = vmul.f32 0.5, %v1073_v20 }
 0x17f   : > { %v1121_v26 = vadd.f32 %v3594_v12, %v1112_v21  ;;  %v1055_v27 = vsub.f32 1.5, %v1054_v22 }
 0x180   : > { %v1119_v18 = vadd.f32 %v3594_v12, %v1110_v23  ;;  %v1096_v31 = vmul.f32 %v3602_v63, %v1095_v24  ;;  %v1075_v32 = vsub.f32 1.5, %v1074_v25  ;;  %v3608_v19 = vpop.eup %3607 }
 0x181   : > { %1127 = vst [vmem:[#allocation2 + $0x8] sm:$0xff] %v1121_v26  ;;  %v1056_v33 = vmul.f32 %v3604_v1, %v1055_v27  ;;  %v1082_v37 = vmul.f32 %v3608_v19, %v4427_v4  ;;  %vm1088_vm0 = vweird.f32 %v3608_v19 }
 0x182   : > { %1125 = vst [vmem:[#allocation2 + $0x28] sm:$0xff] %v1119_v18  ;;  %v1100_v34 = vsel %vm1099_vm12, %v3602_v63, %v1096_v31  ;;  %v1076_v36 = vmul.f32 %v3606_v5, %v1075_v32  ;;  %vm1089_vm2 = vmor %vm1087_vm1, %vm1088_vm0 }
 0x183   : > { %v1106_v38 = vmul.f32 %v1100_v34, %v4398_v28  ;;  %v1060_v39 = vsel %vm1059_vm14, %v3604_v1, %v1056_v33  ;;  %v1083_v42 = vmul.f32 %v3608_v19, %v1082_v37 }
 0x184   : > { %v1102_v40 = vmul.f32 %v1060_v39, %v4402_v30  ;;  %v1080_v41 = vsel %vm1079_vm15, %v3606_v5, %v1076_v36 }
 0x185   : > { %v1115_v43 = vmul.f32 %v4432_v6, %v1106_v38  ;;  %v1104_v44 = vmul.f32 %v1080_v41, %v4400_v29  ;;  %v1084_v46 = vmul.f32 0.5, %v1083_v42 }
 0x186   : > { %v1111_v45 = vmul.f32 %v4432_v6, %v1102_v40 }
 0x187   : > { %v1124_v47 = vadd.f32 %v3594_v12, %v1115_v43  ;;  %v1113_v48 = vmul.f32 %v4432_v6, %v1104_v44  ;;  %v1085_v28 = vsub.f32 1.5, %v1084_v46 }
 0x188   : > { %v1120_v49 = vadd.f32 %v3594_v12, %v1111_v45 }
 0x189   : > { %1130 = vst [vmem:[#allocation2 + $0x20] sm:$0xff] %v1124_v47  ;;  %v1122_v50 = vadd.f32 %v3594_v12, %v1113_v48  ;;  %v1086_v51 = vmul.f32 %v3608_v19, %v1085_v28 }
 0x18a   : > { %1126 = vst [vmem:[#allocation2 + $0x10] sm:$0xff] %v1120_v49 }
 0x18b   : > { %1128 = vst [vmem:[#allocation2] sm:$0xff] %v1122_v50  ;;  %v1090_v30 = vsel %vm1089_vm2, %v3608_v19, %v1086_v51 }
 0x18c   : > { %v1105_v29 = vmul.f32 %v1090_v30, %v4411_v35 }
 0x18e   : > { %v1114_v52 = vmul.f32 %v4432_v6, %v1105_v29 }
 0x190   : > { %v1123_v53 = vadd.f32 %v3594_v12, %v1114_v52 }
 0x192   : > { %1129 = vst [vmem:[#allocation2 + $0x18] sm:$0xff] %v1123_v53 }
 0x193 PF: > { %v3409_v54 = vld [vmem:[%s4299_s28 + $0xac] sm:$0xf]  ;;  %v3165_v55 = vld [vmem:[%s4299_s28 + $0xb4] sm:$0xf0]  ;;  %v3406_v56 = vld [vmem:[%s4299_s28 + $0x94] sm:$0xf] }
 0x194   : > { %v3168_v57 = vor.u32 %v3409_v54, %v3165_v55  ;;  %v3153_v35 = vld [vmem:[%s4299_s28 + $0x9c] sm:$0xf0]  ;;  %v3403_v59 = vld [vmem:[%s4299_s28 + $0x7c] sm:$0xf]  ;;  %v3141_v60 = vld [vmem:[%s4299_s28 + $0x84] sm:$0xf0] }
 0x195   : > { %v3156_v58 = vor.u32 %v3406_v56, %v3153_v35  ;;  %v3400_v61 = vld [vmem:[%s4299_s28 + $0x64] sm:$0xf]  ;;  %v3129_v62 = vld [vmem:[%s4299_s28 + $0x6c] sm:$0xf0]  ;;  %v3144_v63 = vor.u32 %v3403_v59, %v3141_v60  ;;  %v3397_v1 = vld [vmem:[%s4299_s28 + $0x4c] sm:$0xf] }
 0x196   : > { %1333 = vmatpush.bf16.msra.mxu1 %v3168_v57  ;;  %v3132_v0 = vor.u32 %v3400_v61, %v3129_v62  ;;  %v3117_v2 = vld [vmem:[%s4299_s28 + $0x54] sm:$0xf0]  ;;  %v3394_v4 = vld [vmem:[%s4299_s28 + $0x34] sm:$0xf]  ;;  %v3105_v5 = vld [vmem:[%s4299_s28 + $0x3c] sm:$0xf0] }
 0x197   : > { %v3120_v3 = vor.u32 %v3397_v1, %v3117_v2  ;;  %v3163_v6 = vld [vmem:[%s4299_s28 + $0xa8] sm:$0xf]  ;;  %v3410_v7 = vld [vmem:[%s4299_s28 + $0xb0] sm:$0xf0]  ;;  %v3151_v9 = vld [vmem:[%s4299_s28 + $0x90] sm:$0xf]  ;;  %v3108_v11 = vor.u32 %v3394_v4, %v3105_v5 }
 0x198   : > { %v3164_v8 = vor.u32 %v3410_v7, %v3163_v6  ;;  %v3407_v10 = vld [vmem:[%s4299_s28 + $0x98] sm:$0xf0]  ;;  %v3093_v14 = vld [vmem:[%s4299_s28 + $0x24] sm:$0xf0]  ;;  %v3388_v16 = vld [vmem:[%s4299_s28 + $0x4] sm:$0xf] }
 0x199   : > { %v3152_v12 = vor.u32 %v3407_v10, %v3151_v9  ;;  %v3391_v13 = vld [vmem:[%s4299_s28 + $0x1c] sm:$0xf]  ;;  %v3081_v17 = vld [vmem:[%s4299_s28 + $0xc] sm:$0xf0]  ;;  %v3139_v20 = vld [vmem:[%s4299_s28 + $0x78] sm:$0xf] }
 0x19a   : > { %1334 = vmatpush.bf16.msra.mxu1 %v3156_v58  ;;  %1309 = vmatpush.bf16.msra.mxu0 %v3164_v8  ;;  %v3096_v15 = vor.u32 %v3391_v13, %v3093_v14  ;;  %v3404_v21 = vld [vmem:[%s4299_s28 + $0x80] sm:$0xf0]  ;;  %v3084_v23 = vor.u32 %v3388_v16, %v3081_v17  ;;  %v4481_v24 = vld [vmem:[#allocation2 + $0x28] sm:$0xff]  ;;  %v3127_v26 = vld [vmem:[%s4299_s28 + $0x60] sm:$0xf]  ;;  %s3997_s11 = smov 64  }
 0x19b   : > { %v3140_v22 = vor.u32 %v3404_v21, %v3139_v20  ;;  %v4483_v25 = vld [vmem:[#allocation2 + $0x10] sm:$0xff]  ;;  %v3401_v27 = vld [vmem:[%s4299_s28 + $0x68] sm:$0xf0]  ;;  %v3115_v32 = vld [vmem:[%s4299_s28 + $0x48] sm:$0xf]  ;;  %vm1393_vm3 = vcmask 523264  }
 0x19c   : > { %v3128_v18 = vor.u32 %v3401_v27, %v3127_v26  ;;  %v4489_v31 = vpack.c.bf16 %v4483_v25, %v4481_v24  ;;  %v3398_v19 = vld [vmem:[%s4299_s28 + $0x50] sm:$0xf0]  ;;  %v3103_v34 = vld [vmem:[%s4299_s28 + $0x30] sm:$0xf]  ;;  %v3395_v36 = vld [vmem:[%s4299_s28 + $0x38] sm:$0xf0] }
 0x19d   : > { %v3116_v33 = vor.u32 %v3398_v19, %v3115_v32  ;;  %v3104_v37 = vor.u32 %v3395_v36, %v3103_v34  ;;  %v3091_v38 = vld [vmem:[%s4299_s28 + $0x18] sm:$0xf]  ;;  %v3392_v39 = vld [vmem:[%s4299_s28 + $0x20] sm:$0xf0]  ;;  %v3079_v41 = vld [vmem:[%s4299_s28] sm:$0xf] }
 0x19e   : > { %1335 = vmatpush.bf16.msra.mxu1 %v3144_v63  ;;  %1310 = vmatpush.bf16.msra.mxu0 %v3152_v12  ;;  %v3092_v40 = vor.u32 %v3392_v39, %v3091_v38  ;;  %v3389_v42 = vld [vmem:[%s4299_s28 + $0x8] sm:$0xf0]  ;;  %v4500_v43 = vld [vmem:[#allocation2 + $0x8] sm:$0xff]  ;;  %v4502_v44 = vld [vmem:[#allocation2] sm:$0xff]  ;;  %s5114_s12 = sld [smem:[#allocation28_spill]]  ;;  %vm1436_vm4 = vcmask 392192  }
 0x19f   : > { %v3080_v45 = vor.u32 %v3389_v42, %v3079_v41  ;;  %v4506_v46 = vpack.c.bf16 %v4502_v44, %v4500_v43  ;;  %v4510_v47 = vld [vmem:[#allocation2 + $0x18] sm:$0xff]  ;;  %v4512_v48 = vld [vmem:[#allocation2 + $0x20] sm:$0xff]  ;;  %v3411_v21 = vld [vmem:[%s4299_s28 + $0xb8] sm:$0xf0]  ;;  %s5116_s19 = sld [smem:[#allocation34_spill]] }
 0x1a0   : > { %v4516_v49 = vpack.c.bf16 %v4512_v48, %v4510_v47  ;;  %v4522_v50 = vld [vmem:[%s4344_s27] sm:$0x7]  ;;  %v3408_v26 = vld [vmem:[%s4299_s28 + $0xa0] sm:$0xf0]  ;;  %v3405_v32 = vld [vmem:[%s4299_s28 + $0x88] sm:$0xf0] }
 0x1a1   : > { %v1176_v51 = vperm.slane %v4522_v50, 1  ;;  %v1175_v56 = vperm.slane %v4522_v50, 0  ;;  %v3171_v20 = vld [vmem:[%s4299_s28 + $0xb0] sm:$0xf]  ;;  %v3402_v34 = vld [vmem:[%s4299_s28 + $0x70] sm:$0xf0] }
 0x1a2   : > { %1336 = vmatpush.bf16.msra.mxu1 %v3132_v0  ;;  %1311 = vmatpush.bf16.msra.mxu0 %v3140_v22  ;;  %v3159_v22 = vld [vmem:[%s4299_s28 + $0x98] sm:$0xf]  ;;  %v3399_v38 = vld [vmem:[%s4299_s28 + $0x58] sm:$0xf0]  ;;  %v3396_v41 = vld [vmem:[%s4299_s28 + $0x40] sm:$0xf0] }
 0x1a3   : > { %v3160_v27 = vor.u32 %v3408_v26, %v3159_v22  ;;  %s5118_s6 = sld [smem:[#allocation35_spill]] }
 0x1a4   : > { %s5115_s23 = scalar_lea.vmem %s5114_s12, %s5147_s17  ;;  %s5120_s22 = sld [smem:[#allocation36_spill]] }
 0x1a5   : > { %s5117_s26 = scalar_lea.vmem %s5116_s19, %s4321_s15 }
 0x1a6   : > { %1337 = vmatpush.bf16.msra.mxu1 %v3120_v3  ;;  %1312 = vmatpush.bf16.msra.mxu0 %v3128_v18  ;;  %v3147_v18 = vld [vmem:[%s4299_s28 + $0x80] sm:$0xf] }
 0x1a7   : > { %v3148_v19 = vor.u32 %v3405_v32, %v3147_v18 }
 0x1a9   : > { %s5119_s9 = scalar_lea.vmem %s5118_s6, %s4321_s15 }
 0x1aa   : > { %1338 = vmatpush.bf16.msra.mxu1 %v3108_v11  ;;  %1313 = vmatpush.bf16.msra.mxu0 %v3116_v33  ;;  %v3135_v33 = vld [vmem:[%s4299_s28 + $0x68] sm:$0xf]  ;;  %s5121_s30 = scalar_lea.vmem %s5120_s22, %s4321_s15  ;;  %s5125_s15 = sld [smem:[#allocation18_spill]] }
 0x1ab   : > { %v3136_v36 = vor.u32 %v3402_v34, %v3135_v33 }
 0x1ae   : > { %1339 = vmatpush.bf16.msra.mxu1 %v3096_v15  ;;  %1314 = vmatpush.bf16.msra.mxu0 %v3104_v37  ;;  %v3123_v37 = vld [vmem:[%s4299_s28 + $0x50] sm:$0xf] }
 0x1af   : > { %v3124_v39 = vor.u32 %v3399_v38, %v3123_v37 }
 0x1b0   : > { %p3345_p9 = scmp.ne.s32.totalorder %s5125_s15, 1 }
 0x1b1   : > { %s5128_s1 = sld [smem:[#allocation44_spill]] (!%p3345_p9)  ;;  %s3999_s10 = smov (!%p3345_p9), 127  }
 0x1b2   : > { %1340 = vmatpush.bf16.msra.mxu1 %v3084_v23  ;;  %1315 = vmatpush.bf16.msra.mxu0 %v3092_v40  ;;  %v3172_v23 = vor.u32 %v3411_v21, %v3171_v20  ;;  %v3111_v40 = vld [vmem:[%s4299_s28 + $0x38] sm:$0xf] }
 0x1b3   : > { %v3112_v42 = vor.u32 %v3396_v41, %v3111_v40 }
 0x1b4   : > { %1357 = vmatpush.bf16.msra.mxu2 %v3172_v23 }
 0x1b5   : > { %1341 = vmatmul.bf16.vlgmr.msra.gmra.mxu1 %v4489_v31 }
 0x1b6   : > { %1316 = vmatpush.bf16.msra.mxu0 %v3080_v45  ;;  %v3099_v45 = vld [vmem:[%s4299_s28 + $0x20] sm:$0xf] }
 0x1b8   : > { %1358 = vmatpush.bf16.msra.mxu2 %v3160_v27 }
 0x1b9   : > { %1317 = vmatmul.bf16.vlgmr.msra.gmra.mxu0 %v4489_v31 }
 0x1bc   : > { %1359 = vmatpush.bf16.msra.mxu2 %v3148_v19 }
 0x1c0   : > { %1360 = vmatpush.bf16.msra.mxu2 %v3136_v36 }
 0x1c4   : > { %1361 = vmatpush.bf16.msra.mxu2 %v3124_v39 }
 0x1c5   : > { %1346 = vmatmul.bf16.gmra.mxu1 %v4506_v46 }
 0x1c8   : > { %1362 = vmatpush.bf16.msra.mxu2 %v3112_v42 }
 0x1c9   : > { %1322 = vmatmul.bf16.gmra.mxu0 %v4506_v46 }
 0x1d5   : > { %1351 = vmatmul.bf16.gmra.mxu1 %v4516_v49 }
 0x1d9   : > { %1327 = vmatmul.bf16.gmra.mxu0 %v4516_v49 }
 0x232   : > { %v1342_v28 = vpop.f32.mrf.mxu1 }
 0x233   : > { %v1343_v29 = vadd.f32 %v1342_v28, %v1176_v51  ;;  %v3393_v28 = vld [vmem:[%s4299_s28 + $0x28] sm:$0xf0] }
 0x236   : > { %v1318_v55 = vpop.f32.mrf.mxu0 }
 0x237   : > { %v1319_v35 = vadd.f32 %v1318_v55, %v1175_v56 }
 0x23a   : > { %v1344_v30 = vpop.f32.mrf.mxu1 }
 0x23b   : > { %v1345_v52 = vadd.f32 %v1344_v30, %v1176_v51  ;;  %v3087_v30 = vld [vmem:[%s4299_s28 + $0x8] sm:$0xf] }
 0x23d   : > { %v1384_v53 = vpack.c.bf16 %v1345_v52, %v1343_v29  ;;  %v3390_v29 = vld [vmem:[%s4299_s28 + $0x10] sm:$0xf0] }
 0x23e   : > { %v1320_v58 = vpop.f32.mrf.mxu0  ;;  %v3088_v52 = vor.u32 %v3390_v29, %v3087_v30 }
 0x23f   : > { %1551 = vrot.lane.b32.xlu1 %v1384_v53, %s3997_s11  ;;  %v1321_v59 = vadd.f32 %v1320_v58, %v1175_v56  ;;  %v1404_v14 = vsel %vm1393_vm3, %v1384_v53, 0 }
 0x241   : > { %v1381_v60 = vpack.c.bf16 %v1321_v59, %v1319_v35  ;;  %v4566_v59 = vld [vmem:[%s5115_s23] ss:$0 sm:$0xff] }
 0x242   : > { %v1347_v54 = vpop.f32.mrf.mxu1 }
 0x243   : > { %v1348_v8 = vadd.f32 %v1347_v54, %v1176_v51 }
 0x246   : > { %v1323_v62 = vpop.f32.mrf.mxu0 }
 0x247   : > { %1542 = vrot.lane.b32.xlu1 %v1381_v60, %s3997_s11  ;;  %v1324_v3 = vadd.f32 %v1323_v62, %v1175_v56 }
 0x24a   : > { %v1349_v57 = vpop.f32.mrf.mxu1 }
 0x24b   : > { %v1350_v4 = vadd.f32 %v1349_v57, %v1176_v51 }
 0x24d   : > { %v1385_v10 = vpack.c.bf16 %v1350_v4, %v1348_v8 }
 0x24e   : > { %v1325_v6 = vpop.f32.mrf.mxu0 }
 0x24f   : > { %v1326_v7 = vadd.f32 %v1325_v6, %v1175_v56  ;;  %v1407_v11 = vsel %vm1393_vm3, %v1385_v10, 0 }
 0x251   : > { %v1382_v9 = vpack.c.bf16 %v1326_v7, %v1324_v3  ;;  %v1177_v7 = vperm.slane %v4522_v50, 2 }
 0x252   : > { %v1352_v61 = vpop.f32.mrf.mxu1 }
 0x253   : > { %v1353_v0 = vadd.f32 %v1352_v61, %v1176_v51  ;;  %1544 = vrot.lane.b32.xlu2 %v1382_v9, %s3997_s11 }
 0x256   : > { %v1328_v12 = vpop.f32.mrf.mxu0 }
 0x257   : > { %v1329_v13 = vadd.f32 %v1328_v12, %v1175_v56 }
 0x25a   : > { %v1354_v63 = vpop.f32.mrf.mxu1 }
 0x25b   : > { %v1355_v1 = vadd.f32 %v1354_v63, %v1176_v51  ;;  %v3100_v51 = vor.u32 %v3393_v28, %v3099_v45 }
 0x25d   : > { %v1386_v2 = vpack.c.bf16 %v1355_v1, %v1353_v0  ;;  %1363 = vmatpush.bf16.msra.mxu2 %v3100_v51 }
 0x25e   : > { %v1330_v15 = vpop.f32.mrf.mxu0 }
 0x25f   : > { %1555 = vrot.lane.b32.xlu0 %v1386_v2, %s3997_s11  ;;  %v1410_v5 = vsel %vm1393_vm3, %v1386_v2, 0  ;;  %v1331_v16 = vadd.f32 %v1330_v15, %v1175_v56 }
 0x260   : > { %1417 = vmatpush.bf16.xpose.msra.mxu3 %v1410_v5 }
 0x261   : > { %v1383_v17 = vpack.c.bf16 %v1331_v16, %v1329_v13  ;;  %1364 = vmatpush.bf16.msra.mxu2 %v3088_v52 }
 0x263   : > { %1546 = vrot.lane.b32.xlu2 %v1383_v17, %s3997_s11 }
 0x264   : > { %1365 = vmatmul.bf16.vlgmr.msra.gmra.mxu2 %v4489_v31 }
 0x267   : > { %1553 = vrot.lane.b32.xlu0 %v1385_v10, %s3997_s11 }
 0x268   : > { %1418 = vmatpush.bf16.xpose.msra.mxu3 %v1407_v11 }
 0x270   : > { %1419 = vmatpush.bf16.xpose.msra.mxu3 %v1404_v14 }
 0x274   : > { %1370 = vmatmul.bf16.gmra.mxu2 %v4506_v46 }
 0x277   : > { %3173 = vmatmul.msk.bf16.vlgmr.msra.gmra.mxu3 %vm1393_vm3, %v1381_v60 }
 0x284   : > { %1375 = vmatmul.bf16.gmra.mxu2 %v4516_v49 }
 0x287   : > { %3174 = vmatmul.msk.bf16.gmra.mxu3 %vm1393_vm3, %v1382_v9 }
 0x297   : > { %3175 = vmatmul.msk.bf16.gmra.mxu3 %vm1393_vm3, %v1383_v17 }
 0x2ad   : > { %v1545_v31 = vpop.permute.xlu2 %1544 }
 0x2b1   : > { %v1552_v57 = vpop.permute.xlu1 %1551 }
 0x2b2   : > { %v1567_v35 = vsel %vm1393_vm3, %v1552_v57, 0 }
 0x2b9   : > { %v1543_v58 = vpop.permute.xlu1 %1542 }
 0x2bd   : > { %v1547_v0 = vpop.permute.xlu2 %1546 }
 0x2d1   : > { %v1556_v53 = vpop.permute.xlu0 %1555 }
 0x2d2   : > { %v1573_v54 = vsel %vm1393_vm3, %v1556_v53, 0 }
 0x2d3   : > { %1580 = vmatpush.bf16.xpose.msrb.mxu0 %v1573_v54 }
 0x2d9   : > { %v1554_v55 = vpop.permute.xlu0 %1553 }
 0x2da   : > { %v1570_v56 = vsel %vm1393_vm3, %v1554_v55, 0 }
 0x2db   : > { %1581 = vmatpush.bf16.xpose.msrb.mxu0 %v1570_v56 }
 0x2e3   : > { %1582 = vmatpush.bf16.xpose.msrb.mxu0 %v1567_v35 }
 0x2e7   : > { %v1366_v8 = vpop.f32.mrf.mxu2 }
 0x2e8   : > { %v1367_v9 = vadd.f32 %v1366_v8, %v1177_v7 }
 0x2ea   : > { %3179 = vmatmul.msk.bf16.vlgmr.msrb.gmra.mxu0 %vm1393_vm3, %v1543_v58 }
 0x2ef   : > { %v1368_v10 = vpop.f32.mrf.mxu2 }
 0x2f0   : > { %v1369_v11 = vadd.f32 %v1368_v10, %v1177_v7 }
 0x2f2   : > { %v1387_v53 = vpack.c.bf16 %v1369_v11, %v1367_v9 }
 0x2f7   : > { %v1371_v12 = vpop.f32.mrf.mxu2 }
 0x2f8   : > { %v1372_v32 = vadd.f32 %v1371_v12, %v1177_v7 }
 0x2fa   : > { %v1421_v60 = vpop.f32.mrf.mxu3  ;;  %3180 = vmatmul.msk.bf16.gmra.mxu0 %vm1393_vm3, %v1545_v31 }
 0x2fb   : > { %v4570_v46 = vadd.f32 %v4566_v59, %v1421_v60 }
 0x2fd   : > { %v1437_v61 = vsel %vm1436_vm4, %v4570_v46, -inf }
 0x2fe   : > { %1438 = vmax.xlane.f32.xlu2 %v1437_v61 }
 0x2ff   : > { %v1373_v13 = vpop.f32.mrf.mxu2 }
 0x300   : > { %v1374_v19 = vadd.f32 %v1373_v13, %v1177_v7 }
 0x302   : > { %v1423_v62 = vpop.f32.mrf.mxu3  ;;  %v1388_v36 = vpack.c.bf16 %v1374_v19, %v1372_v32 }
 0x303   : > { %v4575_v49 = vadd.f32 %v4566_v59, %v1423_v62 }
 0x305   : > { %v1440_v63 = vsel %vm1436_vm4, %v4575_v49, -inf }
 0x306   : > { %1441 = vmax.xlane.f32.xlu0 %v1440_v63 }
 0x307   : > { %v1376_v17 = vpop.f32.mrf.mxu2 }
 0x308   : > { %v1377_v50 = vadd.f32 %v1376_v17, %v1177_v7 }
 0x30a   : > { %v1426_v1 = vpop.f32.mrf.mxu3  ;;  %3181 = vmatmul.msk.bf16.gmra.mxu0 %vm1393_vm3, %v1547_v0 }
 0x30b   : > { %v4581_v2 = vadd.f32 %v4566_v59, %v1426_v1 }
 0x30d   : > { %v1443_v3 = vsel %vm1436_vm4, %v4581_v2, -inf }
 0x30e   : > { %1444 = vmax.xlane.f32.xlu1 %v1443_v3 }
 0x30f   : > { %v1378_v23 = vpop.f32.mrf.mxu2 }
 0x310   : > { %v1379_v27 = vadd.f32 %v1378_v23, %v1177_v7 }
 0x312   : > { %v1428_v4 = vpop.f32.mrf.mxu3  ;;  %v1389_v33 = vpack.c.bf16 %v1379_v27, %v1377_v50 }
 0x313   : > { %v4586_v5 = vadd.f32 %v4566_v59, %v1428_v4 }
 0x314   : > { %1520 = vmatpush.bf16.msrb.mxu3 %v1389_v33 }
 0x315   : > { %v1446_v6 = vsel %vm1436_vm4, %v4586_v5, -inf }
 0x316   : > { %1447 = vmax.xlane.f32.xlu2 %v1446_v6 }
 0x318   : > { %1521 = vmatpush.bf16.msrb.mxu3 %v1388_v36 }
 0x31a   : > { %v1431_v30 = vpop.f32.mrf.mxu3 }
 0x31b   : > { %v4623_v3 = vadd.f32 %v4566_v59, %v1431_v30 }
 0x31c   : > { %1522 = vmatpush.bf16.msrb.mxu3 %v1387_v53 }
 0x31d   : > { %v1449_v8 = vsel %vm1436_vm4, %v4623_v3, -inf }
 0x322   : > { %v1433_v29 = vpop.f32.mrf.mxu3 }
 0x323   : > { %v4612_v52 = vadd.f32 %v4566_v59, %v1433_v29 }
 0x325   : > { %v1452_v54 = vsel %vm1436_vm4, %v4612_v52, -inf }
 0x367   : > { %v1584_v14 = vpop.f32.mrf.mxu0 }
 0x368   : > { %v1585_v15 = vadd.f32 %v4566_v59, %v1584_v14 }
 0x36a   : > { %v1599_v16 = vsel %vm1436_vm4, %v1585_v15, -inf }
 0x36b   : > { %1600 = vmax.xlane.f32.xlu0 %v1599_v16 }
 0x36f   : > { %v1586_v20 = vpop.f32.mrf.mxu0 }
 0x370   : > { %v1587_v21 = vadd.f32 %v4566_v59, %v1586_v20 }
 0x371   : > { %v1439_v56 = vpop.xlane.xlu2 %1438 }
 0x372   : > { %v1602_v22 = vsel %vm1436_vm4, %v1587_v21, -inf  ;;  %v1455_v11 = vsub.f32 %v4570_v46, %v1439_v56 }
 0x373   : > { %1603 = vmax.xlane.f32.xlu1 %v1602_v22 }
 0x374   : > { %v1461_v13 = vmul.f32 1.442695, %v1455_v11 }
 0x377   : > { %v1589_v26 = vpop.f32.mrf.mxu0 }
 0x378   : > { %v4596_v18 = vadd.f32 %v4566_v59, %v1589_v26 }
 0x379   : > { %v1442_v55 = vpop.xlane.xlu0 %1441 }
 0x37a   : > { %v1605_v34 = vsel %vm1436_vm4, %v4596_v18, -inf  ;;  %v1456_v16 = vsub.f32 %v4575_v49, %v1442_v55 }
 0x37b   : > { %1606 = vmax.xlane.f32.xlu2 %v1605_v34 }
 0x37c   : > { %v1463_v46 = vmul.f32 1.442695, %v1456_v16 }
 0x37f   : > { %v1591_v37 = vpop.f32.mrf.mxu0 }
 0x380   : > { %v1592_v38 = vadd.f32 %v4566_v59, %v1591_v37 }
 0x381   : > { %v4616_v57 = vpop.xlane.xlu1 %1444 }
 0x382   : > { %v1608_v39 = vsel %vm1436_vm4, %v1592_v38, -inf }
 0x383   : > { %1609 = vmax.xlane.f32.xlu2 %v1608_v39 }
 0x387   : > { %v1594_v40 = vpop.f32.mrf.mxu0 }
 0x388   : > { %v1595_v41 = vadd.f32 %v4566_v59, %v1594_v40 }
 0x389   : > { %v1448_v60 = vpop.xlane.xlu2 %1447 }
 0x38a   : > { %v1611_v42 = vsel %vm1436_vm4, %v1595_v41, -inf  ;;  %v1458_v20 = vsub.f32 %v4586_v5, %v1448_v60 }
 0x38b   : > { %1612 = vmax.xlane.f32.xlu0 %v1611_v42  ;;  %v1457_v42 = vsub.f32 %v4581_v2, %v4616_v57 }
 0x38c   : > { %v1467_v50 = vmul.f32 1.442695, %v1458_v20 }
 0x38f   : > { %v1596_v45 = vpop.f32.mrf.mxu0 }
 0x390   : > { %v4605_v28 = vadd.f32 %v4566_v59, %v1596_v45 }
 0x392   : > { %v1614_v51 = vsel %vm1436_vm4, %v4605_v28, -inf }
 0x393   : > { %1615 = vmax.xlane.f32.xlu1 %v1614_v51  ;;  %v1465_v51 = vmul.f32 1.442695, %v1457_v42 }
 0x39b   : > { %1675 = vrot.lane.b32.xlu2 %v1389_v33, %s3997_s11 }
 0x39f   : > { %1673 = vrot.lane.b32.xlu0 %v1388_v36, %s3997_s11 }
 0x3c4   : > { %1453 = vmax.xlane.f32.xlu2 %v1452_v54 }
 0x3de   : > { %v1601_v35 = vpop.xlane.xlu0 %1600 }
 0x3df   : > { %v1617_v58 = vsub.f32 %v1585_v15, %v1601_v35 }
 0x3e1   : > { %v1623_v31 = vmul.f32 1.442695, %v1617_v58 }
 0x3e3   : > { %3631 = vpow2.f32 %v1623_v31 }
 0x3e6   : > { %v1604_v61 = vpop.xlane.xlu1 %1603 }
 0x3e7   : > { %v1618_v62 = vsub.f32 %v1587_v21, %v1604_v61 }
 0x3e9   : > { %v4618_v63 = vpop.eup %3631  ;;  %v1625_v0 = vmul.f32 1.442695, %v1618_v62 }
 0x3ea   : > { %v1635_v1 = vsel %vm1436_vm4, %v4618_v63, 0.0 }
 0x3eb   : > { %3633 = vpow2.f32 %v1625_v0  ;;  %1636 = vadd.xlane.f32.xlu0 %v1635_v1 }
 0x3ee   : > { %v1607_v4 = vpop.xlane.xlu2 %1606 }
 0x3ef   : > { %v1619_v34 = vsub.f32 %v4596_v18, %v1607_v4 }
 0x3f1   : > { %v4625_v6 = vpop.eup %3633  ;;  %v1627_v36 = vmul.f32 1.442695, %v1619_v34 }
 0x3f2   : > { %v1638_v7 = vsel %vm1436_vm4, %v4625_v6, 0.0 }
 0x3f3   : > { %1639 = vadd.xlane.f32.xlu1 %v1638_v7  ;;  %1450 = vmax.xlane.f32.xlu0 %v1449_v8 }
 0x3f6   : > { %v1610_v9 = vpop.xlane.xlu2 %1609 }
 0x3f7   : > { %v1620_v10 = vsub.f32 %v1592_v38, %v1610_v9 }
 0x3f9   : > { %v1629_v12 = vmul.f32 1.442695, %v1620_v10 }
 0x3fb   : > { %3635 = vpow2.f32 %v1629_v12 }
 0x3fc   : > { %3637 = vpow2.f32 %v1461_v13 }
 0x3fe   : > { %v1613_v59 = vpop.xlane.xlu0 %1612  ;;  %v1676_v14 = vpop.permute.xlu2 %1675 }
 0x3ff   : > { %v1621_v15 = vsub.f32 %v1595_v41, %v1613_v59  ;;  %1694 = vmatpush.bf16.msrb.mxu1 %v1676_v14 }
 0x401   : > { %v4633_v17 = vpop.eup %3635  ;;  %v1631_v21 = vmul.f32 1.442695, %v1621_v15 }
 0x402   : > { %v1644_v22 = vsel %vm1436_vm4, %v4633_v17, 0.0  ;;  %v4638_v23 = vpop.eup %3637 }
 0x403   : > { %3639 = vpow2.f32 %v1631_v21  ;;  %1645 = vadd.xlane.f32.xlu0 %v1644_v22  ;;  %v1473_v5 = vsel %vm1436_vm4, %v4638_v23, 0.0 }
 0x404   : > { %3641 = vpow2.f32 %v1463_v46 }
 0x405   : > { %3643 = vpow2.f32 %v1467_v50 }
 0x406   : > { %v1616_v37 = vpop.xlane.xlu1 %1615  ;;  %3645 = vpow2.f32 %v1627_v36 }
 0x407   : > { %v1622_v38 = vsub.f32 %v4605_v28, %v1616_v37 }
 0x409   : > { %v4640_v26 = vpop.eup %3639  ;;  %v1633_v40 = vmul.f32 1.442695, %v1622_v38 }
 0x40a   : > { %v1647_v49 = vsel %vm1436_vm4, %v4640_v26, 0.0  ;;  %v3642_v27 = vpop.eup %3641 }
 0x40b   : > { %1648 = vadd.xlane.f32.xlu2 %v1647_v49  ;;  %1474 = vadd.xlane.f32.xlu0 %v1473_v5  ;;  %v4647_v32 = vpop.eup %3643  ;;  %v1476_v19 = vsel %vm1436_vm4, %v3642_v27, 0.0  ;;  %3647 = vpow2.f32 %v1633_v40 }
 0x40c   : > { %1671 = vrot.lane.b32.xlu1 %v1387_v53, %s3997_s11  ;;  %v1482_v33 = vsel %vm1436_vm4, %v4647_v32, 0.0  ;;  %v3646_v41 = vpop.eup %3645  ;;  %3649 = vpow2.f32 %v1465_v51 }
 0x40d   : > { %v1641_v45 = vsel %vm1436_vm4, %v3646_v41, 0.0 }
 0x411   : > { %v1674_v39 = vpop.permute.xlu0 %1673  ;;  %v4657_v29 = vpop.eup %3647 }
 0x412   : > { %1695 = vmatpush.bf16.msrb.mxu1 %v1674_v39  ;;  %v1650_v28 = vsel %vm1436_vm4, %v4657_v29, 0.0  ;;  %v3650_v54 = vpop.eup %3649 }
 0x413   : > { %1477 = vadd.xlane.f32.xlu2 %v1476_v19  ;;  %1483 = vadd.xlane.f32.xlu0 %v1482_v33  ;;  %v1479_v2 = vsel %vm1436_vm4, %v3650_v54, 0.0 }
 0x436   : > { %1642 = vadd.xlane.f32.xlu1 %v1641_v45 }
 0x437   : > { %v1454_v30 = vpop.xlane.xlu2 %1453 }
 0x438   : > { %v1460_v18 = vsub.f32 %v4612_v52, %v1454_v30 }
 0x43a   : > { %v1471_v53 = vmul.f32 1.442695, %v1460_v18  ;;  %v3419_v18 = vld [vmem:[%s4307_s20 + $0x38] sm:$0xff] }
 0x43b   : > { %1814 = vmatpush.bf16.msrb.mxu2 %v3419_v18 }
 0x43c   : > { %3651 = vpow2.f32 %v1471_v53  ;;  %v3418_v53 = vld [vmem:[%s4307_s20 + $0x30] sm:$0xff] }
 0x43e   : > { %1651 = vadd.xlane.f32.xlu1 %v1650_v28 }
 0x43f   : > { %1815 = vmatpush.bf16.msrb.mxu2 %v3418_v53 }
 0x442   : > { %v4663_v55 = vpop.eup %3651 }
 0x443   : > { %v1488_v56 = vsel %vm1436_vm4, %v4663_v55, 0.0 }
 0x446   : > { %1480 = vadd.xlane.f32.xlu1 %v1479_v2 }
 0x44e   : > { %1489 = vadd.xlane.f32.xlu1 %v1488_v56 }
 0x45e   : > { %v1637_v57 = vpop.xlane.xlu0 %1636 }
 0x466   : > { %v1451_v35 = vpop.xlane.xlu0 %1450  ;;  %v1640_v31 = vpop.xlane.xlu1 %1639 }
 0x467   : > { %v1459_v52 = vsub.f32 %v4623_v3, %v1451_v35 }
 0x469   : > { %v1469_v58 = vmul.f32 1.442695, %v1459_v52 }
 0x46b   : > { %3653 = vpow2.f32 %v1469_v58 }
 0x46c   : > { %3655 = vrcp.f32 %v1640_v31  ;;  %v3414_v31 = vld [vmem:[%s4307_s20 + $0x10] sm:$0xff] }
 0x46d   : > { %3657 = vrcp.f32 %v1637_v57  ;;  %v3415_v57 = vld [vmem:[%s4307_s20 + $0x18] sm:$0xff] }
 0x471   : > { %v3654_v60 = vpop.eup %3653 }
 0x472   : > { %v1485_v61 = vsel %vm1436_vm4, %v3654_v60, 0.0  ;;  %v3656_v62 = vpop.eup %3655 }
 0x473   : > { %1486 = vadd.xlane.f32.xlu2 %v1485_v61  ;;  %v3658_v1 = vpop.eup %3657  ;;  %v1660_v4 = vmul.f32 %v3656_v62, %v4625_v6  ;;  %v3412_v61 = vld [vmem:[%s4307_s20] sm:$0xff] }
 0x474   : > { %v1659_v7 = vmul.f32 %v3658_v1, %v4618_v63 }
 0x476   : > { %v1646_v0 = vpop.xlane.xlu0 %1645  ;;  %v1665_v3 = vpack.c.bf16 %v1660_v4, %v1659_v7 }
 0x47e   : > { %v1672_v8 = vpop.permute.xlu1 %1671  ;;  %v1649_v9 = vpop.xlane.xlu2 %1648 }
 0x47f   : > { %1696 = vmatpush.bf16.msrb.mxu1 %v1672_v8  ;;  %v1475_v10 = vpop.xlane.xlu0 %1474 }
 0x480   : > { %3659 = vrcp.f32 %v1475_v10 }
 0x482   : > { %3182 = vmatmul.msk.bf16.vlgmr.msrb.gmra.mxu1 %vm1436_vm4, %v1665_v3 }
 0x486   : > { %v1478_v11 = vpop.xlane.xlu2 %1477  ;;  %v3660_v12 = vpop.eup %3659 }
 0x487   : > { %3661 = vrcp.f32 %v1478_v11  ;;  %v1497_v59 = vmul.f32 %v3660_v12, %v4638_v23  ;;  %v1484_v50 = vpop.xlane.xlu0 %1483 }
 0x488   : > { %3663 = vrcp.f32 %v1646_v0 }
 0x48d   : > { %v3662_v13 = vpop.eup %3661 }
 0x48e   : > { %v1498_v14 = vmul.f32 %v3662_v13, %v3642_v27  ;;  %v3664_v6 = vpop.eup %3663 }
 0x48f   : > { %v1662_v22 = vmul.f32 %v3664_v6, %v4633_v17 }
 0x490   : > { %v1503_v15 = vpack.c.bf16 %v1498_v14, %v1497_v59 }
 0x492   : > { %3176 = vmatmul.msk.bf16.vlgmr.msrb.gmra.mxu3 %vm1436_vm4, %v1503_v15 }
 0x4a9   : > { %v1643_v63 = vpop.xlane.xlu1 %1642 }
 0x4aa   : > { %3665 = vrcp.f32 %v1643_v63 }
 0x4b0   : > { %v3666_v16 = vpop.eup %3665 }
 0x4b1   : > { %v1652_v20 = vpop.xlane.xlu1 %1651  ;;  %v1661_v21 = vmul.f32 %v3666_v16, %v3646_v41 }
 0x4b2   : > { %3667 = vrcp.f32 %v1652_v20 }
 0x4b3   : > { %v1666_v46 = vpack.c.bf16 %v1662_v22, %v1661_v21  ;;  %3669 = vrcp.f32 %v1649_v9 }
 0x4b4   : > { %3671 = vrcp.f32 %v1484_v50 }
 0x4b5   : > { %3183 = vmatmul.msk.bf16.gmra.mxu1 %vm1436_vm4, %v1666_v46 }
 0x4b8   : > { %v3668_v49 = vpop.eup %3667 }
 0x4b9   : > { %v1481_v23 = vpop.xlane.xlu1 %1480  ;;  %v3670_v5 = vpop.eup %3669  ;;  %v1664_v19 = vmul.f32 %v3668_v49, %v4657_v29  ;;  %v3625_v49 = vld [vmem:[%s5117_s26] ss:$0 sm:$0xff] }
 0x4ba   : > { %3673 = vrcp.f32 %v1481_v23  ;;  %v3672_v27 = vpop.eup %3671  ;;  %v1663_v17 = vmul.f32 %v3670_v5, %v4640_v26 }
 0x4bb   : > { %v1500_v36 = vmul.f32 %v3672_v27, %v4647_v32 }
 0x4bc   : > { %v1667_v38 = vpack.c.bf16 %v1664_v19, %v1663_v17 }
 0x4c0   : > { %v3674_v33 = vpop.eup %3673 }
 0x4c1   : > { %v1499_v34 = vmul.f32 %v3674_v33, %v3650_v54  ;;  %v1490_v39 = vpop.xlane.xlu1 %1489  ;;  %v3417_v54 = vld [vmem:[%s4307_s20 + $0x28] sm:$0xff] }
 0x4c2   : > { %3675 = vrcp.f32 %v1490_v39  ;;  %1816 = vmatpush.bf16.msrb.mxu2 %v3417_v54 }
 0x4c3   : > { %v1504_v37 = vpack.c.bf16 %v1500_v36, %v1499_v34 }
 0x4c5   : > { %3177 = vmatmul.msk.bf16.gmra.mxu3 %vm1436_vm4, %v1504_v37  ;;  %3184 = vmatmul.msk.bf16.gmra.mxu1 %vm1436_vm4, %v1667_v38 }
 0x4c8   : > { %v3676_v41 = vpop.eup %3675 }
 0x4c9   : > { %v1502_v32 = vmul.f32 %v3676_v41, %v4663_v55  ;;  %v3416_v55 = vld [vmem:[%s4307_s20 + $0x20] sm:$0xff] }
 0x4ca   : > { %1817 = vmatpush.bf16.msrb.mxu2 %v3416_v55 }
 0x4ce   : > { %1818 = vmatpush.bf16.msrb.mxu2 %v3415_v57 }
 0x4d2   : > { %1819 = vmatpush.bf16.msrb.mxu2 %v3414_v31 }
 0x4e6   : > { %v1487_v40 = vpop.xlane.xlu2 %1486 }
 0x4e7   : > { %3677 = vrcp.f32 %v1487_v40 }
 0x4ed   : > { %v3678_v42 = vpop.eup %3677 }
 0x4ee   : > { %v1501_v45 = vmul.f32 %v3678_v42, %v3654_v60  ;;  %v3413_v60 = vld [vmem:[%s4307_s20 + $0x8] sm:$0xff]  ;;  %s5127_s20 = sld [smem:[#allocation45_spill]] (!%p3345_p9) }
 0x4ef   : > { %1820 = vmatpush.bf16.msrb.mxu2 %v3413_v60 }
 0x4f0   : > { %v1505_v26 = vpack.c.bf16 %v1502_v32, %v1501_v45 }
 0x4f2   : > { %3178 = vmatmul.msk.bf16.gmra.mxu3 %vm1436_vm4, %v1505_v26 }
 0x4f3   : > { %1821 = vmatpush.bf16.msrb.mxu2 %v3412_v61 }
 0x4ff   : > { %v1698_v51 = vpop.f32.mrf.mxu1 }
 0x507   : > { %v1700_v30 = vpop.f32.mrf.mxu1 }
 0x508   : > { %v3609_v29 = vpack.i.bf16 %v1700_v30, %v1698_v51  ;;  %v3998_v51 = vmov 128.0  }
 0x509   : > { %3679 = vrcp.f32 %v3998_v51 }
 0x50a   : > { %3610 = vrot.lane.b32.xlu0 %v3609_v29, %s3997_s11 }
 0x50f   : > { %v3680_v30 = vpop.eup %3679 }
 0x510   : > { %vm1863_vm5 = vweird.f32 %v3680_v30 }
 0x515   : > { %v1524_v62 = vpop.f32.mrf.mxu3 }
 0x51d   : > { %v1526_v7 = vpop.f32.mrf.mxu3 }
 0x532   : > { %v1703_v28 = vpop.f32.mrf.mxu1 }
 0x53a   : > { %v1705_v2 = vpop.f32.mrf.mxu1 }
 0x53b   : > { %v3614_v56 = vpack.i.bf16 %v1705_v2, %v1703_v28 }
 0x53d   : > { %3615 = vrot.lane.b32.xlu2 %v3614_v56, %s3997_s11 }
 0x542   : > { %v1708_v35 = vpop.f32.mrf.mxu1 }
 0x548   : > { %v1529_v10 = vpop.f32.mrf.mxu3 }
 0x54a   : > { %v1710_v52 = vpop.f32.mrf.mxu1 }
 0x54b   : > { %v3619_v58 = vpack.i.bf16 %v1710_v52, %v1708_v35 }
 0x54d   : > { %3620 = vrot.lane.b32.xlu1 %v3619_v58, %s3997_s11  ;;  %s5126_s11 = sld [smem:[#allocation43_spill]] (!%p3345_p9) }
 0x550   : > { %v1531_v59 = vpop.f32.mrf.mxu3 }
 0x575   : > { %v1534_v6 = vpop.f32.mrf.mxu3 }
 0x57c   : > { %v3611_v0 = vpop.permute.xlu0 %3610 }
 0x57d   : > { %v3613_v1 = vunpack.i.h.bf16 %v3611_v0  ;;  %v3612_v4 = vunpack.i.l.bf16 %v3611_v0  ;;  %v1536_v22 = vpop.f32.mrf.mxu3 }
 0x57f   : > { %v1737_v8 = vsel %vm1393_vm3, %v1524_v62, %v3612_v4  ;;  %v1738_v9 = vsel %vm1393_vm3, %v1526_v7, %v3613_v1 }
 0x580   : > { %v1743_v3 = vpack.c.bf16 %v1738_v9, %v1737_v8 }
 0x582   : > { %1822 = vmatmul.bf16.vlgmr.msrb.gmra.mxu2 %v1743_v3 }
 0x597   : > { %v3616_v11 = vpop.permute.xlu2 %3615 }
 0x598   : > { %v3618_v12 = vunpack.i.h.bf16 %v3616_v11  ;;  %v3617_v13 = vunpack.i.l.bf16 %v3616_v11 }
 0x59a   : > { %v1739_v14 = vsel %vm1393_vm3, %v1529_v10, %v3617_v13  ;;  %v1740_v15 = vsel %vm1393_vm3, %v1531_v59, %v3618_v12  ;;  %v3275_v12 = vld [vmem:[%s4309_s14 + $0x70] sm:$0xf]  ;;  %v3435_v13 = vld [vmem:[%s4309_s14 + $0x74] sm:$0xf0]  ;;  %v3434_v59 = vld [vmem:[%s4309_s14 + $0x74] sm:$0xf] }
 0x59b   : > { %v1744_v63 = vpack.c.bf16 %v1740_v15, %v1739_v14  ;;  %v3276_v14 = vor.u32 %v3435_v13, %v3275_v12  ;;  %v3277_v15 = vld [vmem:[%s4309_s14 + $0x78] sm:$0xf0] }
 0x59d   : > { %1827 = vmatmul.bf16.gmra.mxu2 %v1744_v63  ;;  %v3280_v63 = vor.u32 %v3434_v59, %v3277_v15  ;;  %2096 = vmatpush.bf16.msra.mxu3 %v3276_v14 }
 0x59f   : > { %2120 = vmatpush.bf16.msra.mxu0 %v3280_v63 }
 0x5bf   : > { %v3621_v16 = vpop.permute.xlu1 %3620 }
 0x5c0   : > { %v3623_v20 = vunpack.i.h.bf16 %v3621_v16  ;;  %v3622_v21 = vunpack.i.l.bf16 %v3621_v16  ;;  %v3433_v16 = vld [vmem:[%s4309_s14 + $0x64] sm:$0xf0] }
 0x5c2   : > { %v1741_v46 = vsel %vm1393_vm3, %v1534_v6, %v3622_v21  ;;  %v1742_v50 = vsel %vm1393_vm3, %v1536_v22, %v3623_v20  ;;  %v3267_v6 = vld [vmem:[%s4309_s14 + $0x60] sm:$0xf]  ;;  %v3432_v20 = vld [vmem:[%s4309_s14 + $0x64] sm:$0xf]  ;;  %v3269_v22 = vld [vmem:[%s4309_s14 + $0x68] sm:$0xf0] }
 0x5c3   : > { %v1745_v23 = vpack.c.bf16 %v1742_v50, %v1741_v46  ;;  %v3268_v21 = vor.u32 %v3433_v16, %v3267_v6  ;;  %v3272_v46 = vor.u32 %v3432_v20, %v3269_v22  ;;  %v3259_v50 = vld [vmem:[%s4309_s14 + $0x50] sm:$0xf] }
 0x5c5   : > { %1832 = vmatmul.bf16.gmra.mxu2 %v1745_v23  ;;  %2097 = vmatpush.bf16.msra.mxu3 %v3268_v21  ;;  %v3431_v23 = vld [vmem:[%s4309_s14 + $0x54] sm:$0xf0] }
 0x5c6   : > { %2121 = vmatpush.bf16.msra.mxu0 %v3272_v46  ;;  %v4783_v46 = vld [vmem:[%s5119_s9] ss:$0 sm:$0xff] }
 0x605   : > { %v1823_v5 = vpop.f32.mrf.mxu2 }
 0x606   : > { %v1824_v27 = vadd.f32 %v3625_v49, %v1823_v5  ;;  %v3260_v5 = vor.u32 %v3431_v23, %v3259_v50 }
 0x608   : > { %v1838_v19 = vadd.f32 %v1824_v27, %v4481_v24  ;;  %v3261_v27 = vld [vmem:[%s4309_s14 + $0x58] sm:$0xf0]  ;;  %2098 = vmatpush.bf16.msra.mxu3 %v3260_v5 }
 0x60a   : > { %1846 = vadd.xlane.f32.xlu0 %v1838_v19 }
 0x60d   : > { %v1825_v33 = vpop.f32.mrf.mxu2 }
 0x60e   : > { %v1826_v34 = vadd.f32 %v3625_v49, %v1825_v33  ;;  %v3251_v33 = vld [vmem:[%s4309_s14 + $0x40] sm:$0xf] }
 0x610   : > { %v1839_v36 = vadd.f32 %v1826_v34, %v4483_v25  ;;  %v3429_v34 = vld [vmem:[%s4309_s14 + $0x44] sm:$0xf0] }
 0x612   : > { %1848 = vadd.xlane.f32.xlu2 %v1839_v36 }
 0x620   : > { %v1828_v17 = vpop.f32.mrf.mxu2 }
 0x621   : > { %v1829_v37 = vadd.f32 %v3625_v49, %v1828_v17  ;;  %v3252_v17 = vor.u32 %v3429_v34, %v3251_v33 }
 0x623   : > { %v1840_v38 = vadd.f32 %v1829_v37, %v4500_v43  ;;  %v1859_v43 = vmul.f32 128.0, %v3680_v30  ;;  %v3253_v37 = vld [vmem:[%s4309_s14 + $0x48] sm:$0xf0]  ;;  %2099 = vmatpush.bf16.msra.mxu3 %v3252_v17 }
 0x625   : > { %1850 = vadd.xlane.f32.xlu1 %v1840_v38  ;;  %v1860_v29 = vsub.f32 1.0, %v1859_v43 }
 0x627   : > { %v1861_v18 = vmul.f32 %v3680_v30, %v1860_v29  ;;  %v3227_v29 = vld [vmem:[%s4309_s14 + $0x10] sm:$0xf] }
 0x628   : > { %v1830_v39 = vpop.f32.mrf.mxu2 }
 0x629   : > { %v1831_v40 = vadd.f32 %v3625_v49, %v1830_v39  ;;  %v1862_v28 = vadd.f32 %v3680_v30, %v1861_v18  ;;  %v3243_v39 = vld [vmem:[%s4309_s14 + $0x30] sm:$0xf]  ;;  %v3423_v18 = vld [vmem:[%s4309_s14 + $0x14] sm:$0xf0] }
 0x62b   : > { %v1841_v41 = vadd.f32 %v1831_v40, %v4502_v44  ;;  %v4711_v44 = vsel %vm1863_vm5, %v3680_v30, %v1862_v28  ;;  %v3427_v40 = vld [vmem:[%s4309_s14 + $0x34] sm:$0xf0]  ;;  %v3237_v30 = vld [vmem:[%s4309_s14 + $0x28] sm:$0xf0]  ;;  %v3422_v28 = vld [vmem:[%s4309_s14 + $0x14] sm:$0xf] }
 0x62d   : > { %1852 = vadd.xlane.f32.xlu0 %v1841_v41 }
 0x648   : > { %v1833_v42 = vpop.f32.mrf.mxu2 }
 0x649   : > { %v1834_v45 = vadd.f32 %v3625_v49, %v1833_v42  ;;  %v3244_v42 = vor.u32 %v3427_v40, %v3243_v39 }
 0x64b   : > { %v1842_v24 = vadd.f32 %v1834_v45, %v4510_v47  ;;  %v3245_v45 = vld [vmem:[%s4309_s14 + $0x38] sm:$0xf0]  ;;  %2100 = vmatpush.bf16.msra.mxu3 %v3244_v42 }
 0x64d   : > { %1854 = vadd.xlane.f32.xlu2 %v1842_v24 }
 0x650   : > { %v1835_v32 = vpop.f32.mrf.mxu2 }
 0x651   : > { %v1836_v26 = vadd.f32 %v3625_v49, %v1835_v32  ;;  %v3430_v49 = vld [vmem:[%s4309_s14 + $0x54] sm:$0xf]  ;;  %v3235_v32 = vld [vmem:[%s4309_s14 + $0x20] sm:$0xf] }
 0x653   : > { %v1843_v25 = vadd.f32 %v1836_v26, %v4512_v48  ;;  %v3425_v26 = vld [vmem:[%s4309_s14 + $0x24] sm:$0xf0] }
 0x654   : > { %v3236_v51 = vor.u32 %v3425_v26, %v3235_v32 }
 0x655   : > { %1856 = vadd.xlane.f32.xlu0 %v1843_v25 }
 0x656   : > { %2101 = vmatpush.bf16.msra.mxu3 %v3236_v51 }
 0x67d   : > { %v1847_v53 = vpop.xlane.xlu0 %1846 }
 0x67e   : > { %v1865_v54 = vmul.f32 %v4711_v44, %v1847_v53  ;;  %v3228_v53 = vor.u32 %v3423_v18, %v3227_v29 }
 0x680   : > { %v4714_v47 = vsub.f32 %v1838_v19, %v1865_v54  ;;  %v3264_v19 = vor.u32 %v3430_v49, %v3261_v27  ;;  %v3229_v54 = vld [vmem:[%s4309_s14 + $0x18] sm:$0xf0]  ;;  %2102 = vmatpush.bf16.msra.mxu3 %v3228_v53 }
 0x682   : > { %v1877_v2 = vmul.f32 %v4714_v47, %v4714_v47  ;;  %2122 = vmatpush.bf16.msra.mxu0 %v3264_v19 }
 0x684   : > { %1883 = vadd.xlane.f32.xlu1 %v1877_v2 }
 0x685   : > { %v1849_v48 = vpop.xlane.xlu2 %1848 }
 0x686   : > { %v1866_v55 = vmul.f32 %v4711_v44, %v1849_v48  ;;  %v3232_v48 = vor.u32 %v3422_v28, %v3229_v54 }
 0x688   : > { %v4719_v56 = vsub.f32 %v1839_v36, %v1866_v55  ;;  %v3428_v36 = vld [vmem:[%s4309_s14 + $0x44] sm:$0xf] }
 0x68a   : > { %v1878_v57 = vmul.f32 %v4719_v56, %v4719_v56 }
 0x68c   : > { %1885 = vadd.xlane.f32.xlu2 %v1878_v57  ;;  %v3219_v57 = vld [vmem:[%s4309_s14] sm:$0xf] }
 0x698   : > { %v1851_v35 = vpop.xlane.xlu1 %1850 }
 0x699   : > { %v1867_v52 = vmul.f32 %v4711_v44, %v1851_v35  ;;  %v3421_v35 = vld [vmem:[%s4309_s14 + $0x4] sm:$0xf0] }
 0x69b   : > { %v4724_v58 = vsub.f32 %v1840_v38, %v1867_v52  ;;  %v3256_v38 = vor.u32 %v3428_v36, %v3253_v37  ;;  %v3420_v52 = vld [vmem:[%s4309_s14 + $0x4] sm:$0xf] }
 0x69d   : > { %v1879_v31 = vmul.f32 %v4724_v58, %v4724_v58  ;;  %2123 = vmatpush.bf16.msra.mxu0 %v3256_v38 }
 0x69f   : > { %1887 = vadd.xlane.f32.xlu0 %v1879_v31 }
 0x6a0   : > { %v1853_v60 = vpop.xlane.xlu0 %1852 }
 0x6a1   : > { %v1868_v61 = vmul.f32 %v4711_v44, %v1853_v60  ;;  %v3220_v60 = vor.u32 %v3421_v35, %v3219_v57 }
 0x6a3   : > { %v4729_v62 = vsub.f32 %v1841_v41, %v1868_v61  ;;  %v3426_v41 = vld [vmem:[%s4309_s14 + $0x34] sm:$0xf]  ;;  %v3221_v61 = vld [vmem:[%s4309_s14 + $0x8] sm:$0xf0]  ;;  %2103 = vmatpush.bf16.msra.mxu3 %v3220_v60 }
 0x6a5   : > { %v1880_v0 = vmul.f32 %v4729_v62, %v4729_v62 }
 0x6a7   : > { %1889 = vadd.xlane.f32.xlu1 %v1880_v0  ;;  %v3224_v0 = vor.u32 %v3420_v52, %v3221_v61 }
 0x6c0   : > { %v1855_v1 = vpop.xlane.xlu2 %1854 }
 0x6c1   : > { %v1869_v4 = vmul.f32 %v4711_v44, %v1855_v1 }
 0x6c3   : > { %v4734_v7 = vsub.f32 %v1842_v24, %v1869_v4  ;;  %v3248_v24 = vor.u32 %v3426_v41, %v3245_v45 }
 0x6c5   : > { %v1881_v8 = vmul.f32 %v4734_v7, %v4734_v7  ;;  %2124 = vmatpush.bf16.msra.mxu0 %v3248_v24 }
 0x6c7   : > { %1891 = vadd.xlane.f32.xlu2 %v1881_v8 }
 0x6c8   : > { %v1857_v9 = vpop.xlane.xlu0 %1856 }
 0x6c9   : > { %v1870_v3 = vmul.f32 %v4711_v44, %v1857_v9 }
 0x6cb   : > { %v4739_v10 = vsub.f32 %v1843_v25, %v1870_v3  ;;  %v3424_v25 = vld [vmem:[%s4309_s14 + $0x24] sm:$0xf] }
 0x6cc   : > { %v3240_v43 = vor.u32 %v3424_v25, %v3237_v30 }
 0x6cd   : > { %v1882_v11 = vmul.f32 %v4739_v10, %v4739_v10 }
 0x6ce   : > { %2125 = vmatpush.bf16.msra.mxu0 %v3240_v43 }
 0x6cf   : > { %1893 = vadd.xlane.f32.xlu0 %v1882_v11 }
 0x6d2   : > { %2126 = vmatpush.bf16.msra.mxu0 %v3232_v48 }
 0x6d6   : > { %2127 = vmatpush.bf16.msra.mxu0 %v3224_v0 }
 0x6f7   : > { %v1884_v2 = vpop.xlane.xlu1 %1883 }
 0x6f8   : > { %v1895_v55 = vmul.f32 %v1884_v2, %v4711_v44 }
 0x6fa   : > { %v1901_v31 = vadd.f32 1e-12, %v1895_v55 }
 0x6fc   : > { %3681 = vrsqrt.f32 %v1901_v31  ;;  %vm1913_vm7 = vweird.f32 %v1901_v31 }
 0x6ff   : > { %v1886_v1 = vpop.xlane.xlu2 %1885 }
 0x700   : > { %v1896_v4 = vmul.f32 %v1886_v1, %v4711_v44 }
 0x702   : > { %v3682_v8 = vpop.eup %3681  ;;  %v1902_v9 = vadd.f32 1e-12, %v1896_v4 }
 0x703   : > { %v1908_v3 = vmul.f32 %v3682_v8, %v1901_v31  ;;  %vm1914_vm6 = vweird.f32 %v3682_v8 }
 0x704   : > { %3683 = vrsqrt.f32 %v1902_v9  ;;  %vm1915_vm8 = vmor %vm1913_vm7, %vm1914_vm6  ;;  %vm1923_vm10 = vweird.f32 %v1902_v9 }
 0x705   : > { %v1909_v11 = vmul.f32 %v3682_v8, %v1908_v3 }
 0x707   : > { %v1910_v12 = vmul.f32 0.5, %v1909_v11 }
 0x709   : > { %v1911_v13 = vsub.f32 1.5, %v1910_v12 }
 0x70a   : > { %v3684_v59 = vpop.eup %3683 }
 0x70b   : > { %v1912_v14 = vmul.f32 %v3682_v8, %v1911_v13  ;;  %v1918_v15 = vmul.f32 %v3684_v59, %v1902_v9  ;;  %vm1924_vm9 = vweird.f32 %v3684_v59 }
 0x70c   : > { %vm1925_vm11 = vmor %vm1923_vm10, %vm1924_vm9 }
 0x70d   : > { %v1919_v63 = vmul.f32 %v3684_v59, %v1918_v15  ;;  %v1916_v6 = vsel %vm1915_vm8, %v3682_v8, %v1912_v14 }
 0x70e   : > { %v1967_v21 = vmul.f32 %v1916_v6, %v4714_v47  ;;  %v4793_v47 = vld [vmem:[%s5121_s30] ss:$0 sm:$0xff] }
 0x70f   : > { %v1920_v16 = vmul.f32 0.5, %v1919_v63 }
 0x710   : > { %v1976_v19 = vmul.f32 %v4783_v46, %v1967_v21 }
 0x711   : > { %v1921_v20 = vsub.f32 1.5, %v1920_v16 }
 0x712   : > { %v1888_v22 = vpop.xlane.xlu0 %1887  ;;  %v4797_v36 = vadd.f32 %v4793_v47, %v1976_v19  ;;  %v3441_v19 = vld [vmem:[%s4374_s16 + $0x28] sm:$0xff] }
 0x713   : > { %v1922_v50 = vmul.f32 %v3684_v59, %v1921_v20  ;;  %v1897_v23 = vmul.f32 %v1888_v22, %v4711_v44 }
 0x715   : > { %v1926_v49 = vsel %vm1925_vm11, %v3684_v59, %v1922_v50  ;;  %v1903_v5 = vadd.f32 1e-12, %v1897_v23  ;;  %v3450_v23 = vld [vmem:[%s4374_s16 + $0x70] sm:$0xff] }
 0x716   : > { %v1968_v27 = vmul.f32 %v1926_v49, %v4719_v56  ;;  %v3449_v49 = vld [vmem:[%s4374_s16 + $0x68] sm:$0xff] }
 0x717   : > { %3685 = vrsqrt.f32 %v1903_v5  ;;  %vm1933_vm13 = vweird.f32 %v1903_v5 }
 0x718   : > { %v1977_v33 = vmul.f32 %v4783_v46, %v1968_v27  ;;  %v3448_v27 = vld [vmem:[%s4374_s16 + $0x60] sm:$0xff] }
 0x71a   : > { %v1890_v34 = vpop.xlane.xlu1 %1889  ;;  %v4800_v17 = vadd.f32 %v4793_v47, %v1977_v33  ;;  %v3440_v33 = vld [vmem:[%s4374_s16 + $0x20] sm:$0xff] }
 0x71b   : > { %v1898_v56 = vmul.f32 %v1890_v34, %v4711_v44  ;;  %v3446_v34 = vld [vmem:[%s4374_s16 + $0x50] sm:$0xff] }
 0x71c   : > { %v1991_v37 = vpack.c.bf16 %v4800_v17, %v4797_v36 }
 0x71d   : > { %v3686_v38 = vpop.eup %3685  ;;  %v1904_v39 = vadd.f32 1e-12, %v1898_v56  ;;  %v3439_v56 = vld [vmem:[%s4374_s16 + $0x18] sm:$0xff] }
 0x71e   : > { %v1928_v40 = vmul.f32 %v3686_v38, %v1903_v5  ;;  %2104 = vmatmul.bf16.vlgmr.msra.gmra.mxu3 %v1991_v37  ;;  %2128 = vmatmul.bf16.vlgmr.msra.gmra.mxu0 %v1991_v37  ;;  %vm1934_vm12 = vweird.f32 %v3686_v38  ;;  %v3442_v5 = vld [vmem:[%s4374_s16 + $0x30] sm:$0xff] }
 0x71f   : > { %3687 = vrsqrt.f32 %v1904_v39  ;;  %vm1935_vm14 = vmor %vm1933_vm13, %vm1934_vm12  ;;  %vm1943_vm0 = vweird.f32 %v1904_v39  ;;  %v2010_v37 = vld [vmem:[%s4350_s4] sm:$0x3] }
 0x720   : > { %v1929_v41 = vmul.f32 %v3686_v38, %v1928_v40  ;;  %v4845_v40 = vperm.slane %v2010_v37, 1 }
 0x722   : > { %v1930_v42 = vmul.f32 0.5, %v1929_v41  ;;  %v3444_v41 = vld [vmem:[%s4374_s16 + $0x40] sm:$0xff] }
 0x724   : > { %v1931_v45 = vsub.f32 1.5, %v1930_v42 }
 0x725   : > { %v3688_v24 = vpop.eup %3687 }
 0x726   : > { %v1932_v32 = vmul.f32 %v3686_v38, %v1931_v45  ;;  %v1938_v26 = vmul.f32 %v3688_v24, %v1904_v39  ;;  %vm1944_vm15 = vweird.f32 %v3688_v24  ;;  %v3438_v39 = vld [vmem:[%s4374_s16 + $0x10] sm:$0xff]  ;;  %v3437_v45 = vld [vmem:[%s4374_s16 + $0x8] sm:$0xff] }
 0x727   : > { %vm1945_vm1 = vmor %vm1943_vm0, %vm1944_vm15 }
 0x728   : > { %v1939_v25 = vmul.f32 %v3688_v24, %v1938_v26  ;;  %v1936_v30 = vsel %vm1935_vm14, %v3686_v38, %v1932_v32  ;;  %v3445_v38 = vld [vmem:[%s4374_s16 + $0x48] sm:$0xff]  ;;  %v4850_v26 = vperm.slane %v2010_v37, 0 }
 0x729   : > { %v1969_v29 = vmul.f32 %v1936_v30, %v4724_v58 }
 0x72a   : > { %v1940_v51 = vmul.f32 0.5, %v1939_v25  ;;  %v3436_v25 = vld [vmem:[%s4374_s16] sm:$0xff] }
 0x72b   : > { %v1978_v54 = vmul.f32 %v4783_v46, %v1969_v29 }
 0x72c   : > { %v1941_v43 = vsub.f32 1.5, %v1940_v51 }
 0x72d   : > { %v4810_v48 = vadd.f32 %v4793_v47, %v1978_v54 }
 0x72e   : > { %v1942_v18 = vmul.f32 %v3688_v24, %v1941_v43 }
 0x730   : > { %v1946_v28 = vsel %vm1945_vm1, %v3688_v24, %v1942_v18 }
 0x731   : > { %v1970_v53 = vmul.f32 %v1946_v28, %v4729_v62 }
 0x733   : > { %v1979_v2 = vmul.f32 %v4783_v46, %v1970_v53 }
 0x735   : > { %v4813_v55 = vadd.f32 %v4793_v47, %v1979_v2 }
 0x737   : > { %v1992_v57 = vpack.c.bf16 %v4813_v55, %v4810_v48 }
 0x739   : > { %2109 = vmatmul.bf16.gmra.mxu3 %v1992_v57  ;;  %2133 = vmatmul.bf16.gmra.mxu0 %v1992_v57 }
 0x73a   : > { %v1892_v58 = vpop.xlane.xlu2 %1891 }
 0x73b   : > { %v1899_v35 = vmul.f32 %v1892_v58, %v4711_v44 }
 0x73d   : > { %v1905_v52 = vadd.f32 1e-12, %v1899_v35 }
 0x73f   : > { %3689 = vrsqrt.f32 %v1905_v52  ;;  %vm1953_vm3 = vweird.f32 %v1905_v52 }
 0x742   : > { %v1894_v62 = vpop.xlane.xlu0 %1893 }
 0x743   : > { %v1900_v31 = vmul.f32 %v1894_v62, %v4711_v44 }
 0x745   : > { %v3690_v60 = vpop.eup %3689  ;;  %v1906_v61 = vadd.f32 1e-12, %v1900_v31 }
 0x746   : > { %v1948_v0 = vmul.f32 %v3690_v60, %v1905_v52  ;;  %vm1954_vm2 = vweird.f32 %v3690_v60 }
 0x747   : > { %3691 = vrsqrt.f32 %v1906_v61  ;;  %vm1955_vm5 = vmor %vm1953_vm3, %vm1954_vm2  ;;  %vm1963_vm7 = vweird.f32 %v1906_v61 }
 0x748   : > { %v1949_v1 = vmul.f32 %v3690_v60, %v1948_v0 }
 0x74a   : > { %v1950_v4 = vmul.f32 0.5, %v1949_v1 }
 0x74c   : > { %v1951_v8 = vsub.f32 1.5, %v1950_v4 }
 0x74d   : > { %v3692_v9 = vpop.eup %3691 }
 0x74e   : > { %v1952_v3 = vmul.f32 %v3690_v60, %v1951_v8  ;;  %v1958_v11 = vmul.f32 %v3692_v9, %v1906_v61  ;;  %vm1964_vm6 = vweird.f32 %v3692_v9 }
 0x74f   : > { %vm1965_vm8 = vmor %vm1963_vm7, %vm1964_vm6 }
 0x750   : > { %v1959_v12 = vmul.f32 %v3692_v9, %v1958_v11  ;;  %v1956_v59 = vsel %vm1955_vm5, %v3690_v60, %v1952_v3 }
 0x751   : > { %v1971_v15 = vmul.f32 %v1956_v59, %v4734_v7 }
 0x752   : > { %v1960_v13 = vmul.f32 0.5, %v1959_v12 }
 0x753   : > { %v1980_v20 = vmul.f32 %v4783_v46, %v1971_v15 }
 0x754   : > { %v1961_v14 = vsub.f32 1.5, %v1960_v13 }
 0x755   : > { %v4824_v22 = vadd.f32 %v4793_v47, %v1980_v20 }
 0x756   : > { %v1962_v63 = vmul.f32 %v3692_v9, %v1961_v14 }
 0x758   : > { %v1966_v6 = vsel %vm1965_vm8, %v3692_v9, %v1962_v63 }
 0x759   : > { %v1972_v16 = vmul.f32 %v1966_v6, %v4739_v10  ;;  %v3451_v10 = vld [vmem:[%s4374_s16 + $0x78] sm:$0xff] }
 0x75a   : > { %2414 = vmatpush.bf16.msra.mxu2 %v3451_v10 }
 0x75b   : > { %v1981_v21 = vmul.f32 %v4783_v46, %v1972_v16  ;;  %v3443_v46 = vld [vmem:[%s4374_s16 + $0x38] sm:$0xff] }
 0x75c   : > { %2390 = vmatpush.bf16.msra.mxu1 %v3443_v46 }
 0x75d   : > { %v4827_v50 = vadd.f32 %v4793_v47, %v1981_v21  ;;  %v3447_v47 = vld [vmem:[%s4374_s16 + $0x58] sm:$0xff] }
 0x75e   : > { %2415 = vmatpush.bf16.msra.mxu2 %v3450_v23 }
 0x75f   : > { %v1993_v7 = vpack.c.bf16 %v4827_v50, %v4824_v22 }
 0x760   : > { %2391 = vmatpush.bf16.msra.mxu1 %v3442_v5 }
 0x761   : > { %2114 = vmatmul.bf16.gmra.mxu3 %v1993_v7  ;;  %2138 = vmatmul.bf16.gmra.mxu0 %v1993_v7 }
 0x762   : > { %2416 = vmatpush.bf16.msra.mxu2 %v3449_v49 }
 0x764   : > { %2392 = vmatpush.bf16.msra.mxu1 %v3441_v19 }
 0x766   : > { %2417 = vmatpush.bf16.msra.mxu2 %v3448_v27 }
 0x768   : > { %2393 = vmatpush.bf16.msra.mxu1 %v3440_v33 }
 0x76a   : > { %2418 = vmatpush.bf16.msra.mxu2 %v3447_v47 }
 0x76c   : > { %2394 = vmatpush.bf16.msra.mxu1 %v3439_v56 }
 0x76e   : > { %2419 = vmatpush.bf16.msra.mxu2 %v3446_v34 }
 0x770   : > { %2395 = vmatpush.bf16.msra.mxu1 %v3438_v39 }
 0x772   : > { %2420 = vmatpush.bf16.msra.mxu2 %v3445_v38 }
 0x774   : > { %2396 = vmatpush.bf16.msra.mxu1 %v3437_v45 }
 0x776   : > { %2421 = vmatpush.bf16.msra.mxu2 %v3444_v41 }
 0x778   : > { %2397 = vmatpush.bf16.msra.mxu1 %v3436_v25 }
 0x79b   : > { %v2129_v42 = vpop.f32.mrf.mxu0 }
 0x79c   : > { %v2130_v24 = vadd.f32 %v2129_v42, %v4845_v40 }
 0x79e   : > { %v2157_v32 = vmul.f32 0.044715, %v2130_v24  ;;  %v2145_v16 = vmul.f32 0.5, %v2130_v24 }
 0x7a0   : > { %v2169_v51 = vmul.f32 %v2157_v32, %v2130_v24 }
 0x7a1   : > { %v2105_v30 = vpop.f32.mrf.mxu3 }
 0x7a2   : > { %v2181_v43 = vmul.f32 %v2169_v51, %v2130_v24  ;;  %v2106_v29 = vadd.f32 %v2105_v30, %v4850_v26 }
 0x7a3   : > { %v2131_v18 = vpop.f32.mrf.mxu0 }
 0x7a4   : > { %v2193_v28 = vadd.f32 %v2181_v43, %v2130_v24  ;;  %v2156_v53 = vmul.f32 0.044715, %v2106_v29  ;;  %v2132_v54 = vadd.f32 %v2131_v18, %v4845_v40  ;;  %v2144_v47 = vmul.f32 0.5, %v2106_v29 }
 0x7a6   : > { %v2168_v2 = vmul.f32 %v2156_v53, %v2106_v29  ;;  %v2159_v57 = vmul.f32 0.044715, %v2132_v54  ;;  %v2205_v58 = vmul.f32 0.7978846, %v2193_v28  ;;  %v2147_v20 = vmul.f32 0.5, %v2132_v54 }
 0x7a8   : > { %v2180_v35 = vmul.f32 %v2168_v2, %v2106_v29  ;;  %v2171_v52 = vmul.f32 %v2159_v57, %v2132_v54  ;;  %3693 = vtanh.f32 %v2205_v58 }
 0x7a9   : > { %v2107_v62 = vpop.f32.mrf.mxu3 }
 0x7aa   : > { %v2192_v31 = vadd.f32 %v2180_v35, %v2106_v29  ;;  %v2183_v60 = vmul.f32 %v2171_v52, %v2132_v54  ;;  %v2108_v61 = vadd.f32 %v2107_v62, %v4850_v26 }
 0x7ac   : > { %v2195_v0 = vadd.f32 %v2183_v60, %v2132_v54  ;;  %v2158_v1 = vmul.f32 0.044715, %v2108_v61  ;;  %v2204_v4 = vmul.f32 0.7978846, %v2192_v31  ;;  %v2146_v34 = vmul.f32 0.5, %v2108_v61 }
 0x7ae   : > { %v2207_v8 = vmul.f32 0.7978846, %v2195_v0  ;;  %v2170_v9 = vmul.f32 %v2158_v1, %v2108_v61  ;;  %v3694_v11 = vpop.eup %3693 }
 0x7af   : > { %v2229_v59 = vadd.f32 1.0, %v3694_v11 }
 0x7b0   : > { %v2182_v3 = vmul.f32 %v2170_v9, %v2108_v61  ;;  %3695 = vtanh.f32 %v2207_v8 }
 0x7b1   : > { %3697 = vtanh.f32 %v2204_v4  ;;  %v2241_v10 = vmul.f32 %v2229_v59, %v2145_v16 }
 0x7b2   : > { %v2194_v12 = vadd.f32 %v2182_v3, %v2108_v61 }
 0x7b4   : > { %v2206_v13 = vmul.f32 0.7978846, %v2194_v12 }
 0x7b6   : > { %v3696_v14 = vpop.eup %3695  ;;  %v2134_v15 = vpop.f32.mrf.mxu0  ;;  %3699 = vtanh.f32 %v2206_v13 }
 0x7b7   : > { %v3698_v63 = vpop.eup %3697  ;;  %v2135_v6 = vadd.f32 %v2134_v15, %v4845_v40  ;;  %v2231_v21 = vadd.f32 1.0, %v3696_v14 }
 0x7b8   : > { %v2228_v46 = vadd.f32 1.0, %v3698_v63 }
 0x7b9   : > { %v2161_v7 = vmul.f32 0.044715, %v2135_v6  ;;  %v2243_v23 = vmul.f32 %v2231_v21, %v2147_v20  ;;  %v2149_v4 = vmul.f32 0.5, %v2135_v6 }
 0x7ba   : > { %v2240_v39 = vmul.f32 %v2228_v46, %v2144_v47 }
 0x7bb   : > { %v2253_v49 = vpack.c.bf16 %v2243_v23, %v2241_v10  ;;  %v2173_v5 = vmul.f32 %v2161_v7, %v2135_v6 }
 0x7bc   : > { %v3700_v27 = vpop.eup %3699  ;;  %v2110_v19 = vpop.f32.mrf.mxu3 }
 0x7bd   : > { %v2111_v33 = vadd.f32 %v2110_v19, %v4850_v26  ;;  %2422 = vmatmul.bf16.vlgmr.msra.gmra.mxu2 %v2253_v49  ;;  %v2230_v56 = vadd.f32 1.0, %v3700_v27  ;;  %v2185_v37 = vmul.f32 %v2173_v5, %v2135_v6 }
 0x7be   : > { %v2136_v38 = vpop.f32.mrf.mxu0 }
 0x7bf   : > { %v2160_v41 = vmul.f32 0.044715, %v2111_v33  ;;  %v2137_v42 = vadd.f32 %v2136_v38, %v4845_v40  ;;  %v2242_v45 = vmul.f32 %v2230_v56, %v2146_v34  ;;  %v2197_v24 = vadd.f32 %v2185_v37, %v2135_v6 }
 0x7c0   : > { %v2148_v15 = vmul.f32 0.5, %v2111_v33 }
 0x7c1   : > { %v2163_v32 = vmul.f32 0.044715, %v2137_v42  ;;  %v2252_v25 = vpack.c.bf16 %v2242_v45, %v2240_v39  ;;  %v2172_v51 = vmul.f32 %v2160_v41, %v2111_v33  ;;  %v2209_v43 = vmul.f32 0.7978846, %v2197_v24 }
 0x7c2   : > { %v2151_v8 = vmul.f32 0.5, %v2137_v42 }
 0x7c3   : > { %2398 = vmatmul.bf16.vlgmr.msra.gmra.mxu1 %v2252_v25  ;;  %v2175_v30 = vmul.f32 %v2163_v32, %v2137_v42  ;;  %v2184_v18 = vmul.f32 %v2172_v51, %v2111_v33  ;;  %3701 = vtanh.f32 %v2209_v43 }
 0x7c4   : > { %v2112_v29 = vpop.f32.mrf.mxu3 }
 0x7c5   : > { %v2113_v28 = vadd.f32 %v2112_v29, %v4850_v26  ;;  %v2187_v53 = vmul.f32 %v2175_v30, %v2137_v42  ;;  %v2196_v54 = vadd.f32 %v2184_v18, %v2111_v33 }
 0x7c7   : > { %v2162_v2 = vmul.f32 0.044715, %v2113_v28  ;;  %v2199_v57 = vadd.f32 %v2187_v53, %v2137_v42  ;;  %v2208_v52 = vmul.f32 0.7978846, %v2196_v54  ;;  %v2150_v63 = vmul.f32 0.5, %v2113_v28 }
 0x7c9   : > { %v2211_v58 = vmul.f32 0.7978846, %v2199_v57  ;;  %v2174_v35 = vmul.f32 %v2162_v2, %v2113_v28  ;;  %v3702_v31 = vpop.eup %3701 }
 0x7ca   : > { %v2233_v0 = vadd.f32 1.0, %v3702_v31 }
 0x7cb   : > { %3703 = vtanh.f32 %v2211_v58  ;;  %v2186_v62 = vmul.f32 %v2174_v35, %v2113_v28 }
 0x7cc   : > { %3705 = vtanh.f32 %v2208_v52  ;;  %v2245_v11 = vmul.f32 %v2233_v0, %v2149_v4 }
 0x7cd   : > { %v2198_v60 = vadd.f32 %v2186_v62, %v2113_v28 }
 0x7cf   : > { %v2210_v61 = vmul.f32 0.7978846, %v2198_v60 }
 0x7d1   : > { %v3704_v1 = vpop.eup %3703  ;;  %3707 = vtanh.f32 %v2210_v61 }
 0x7d2   : > { %v2235_v9 = vadd.f32 1.0, %v3704_v1  ;;  %v3706_v3 = vpop.eup %3705 }
 0x7d3   : > { %v2232_v59 = vadd.f32 1.0, %v3706_v3 }
 0x7d4   : > { %v2247_v12 = vmul.f32 %v2235_v9, %v2151_v8 }
 0x7d5   : > { %v2244_v20 = vmul.f32 %v2232_v59, %v2148_v15 }
 0x7d6   : > { %v2255_v13 = vpack.c.bf16 %v2247_v12, %v2245_v11  ;;  %v3628_v11 = vld [vmem:[%s952_s3] ss:$0 sm:$0xff] }
 0x7d7   : > { %v3708_v14 = vpop.eup %3707 }
 0x7d8   : > { %2427 = vmatmul.bf16.gmra.mxu2 %v2255_v13  ;;  %v2234_v16 = vadd.f32 1.0, %v3708_v14 }
 0x7da   : > { %v2246_v21 = vmul.f32 %v2234_v16, %v2150_v63 }
 0x7dc   : > { %v2254_v7 = vpack.c.bf16 %v2246_v21, %v2244_v20 }
 0x7de   : > { %v2139_v10 = vpop.f32.mrf.mxu0  ;;  %2403 = vmatmul.bf16.gmra.mxu1 %v2254_v7 }
 0x7df   : > { %v2140_v23 = vadd.f32 %v2139_v10, %v4845_v40 }
 0x7e1   : > { %v2165_v6 = vmul.f32 0.044715, %v2140_v23  ;;  %v2153_v57 = vmul.f32 0.5, %v2140_v23 }
 0x7e3   : > { %v2177_v46 = vmul.f32 %v2165_v6, %v2140_v23 }
 0x7e4   : > { %v2115_v49 = vpop.f32.mrf.mxu3 }
 0x7e5   : > { %v2116_v5 = vadd.f32 %v2115_v49, %v4850_v26  ;;  %v2189_v27 = vmul.f32 %v2177_v46, %v2140_v23 }
 0x7e6   : > { %v2141_v19 = vpop.f32.mrf.mxu0 }
 0x7e7   : > { %v2164_v47 = vmul.f32 0.044715, %v2116_v5  ;;  %v2142_v34 = vadd.f32 %v2141_v19, %v4845_v40  ;;  %v2201_v33 = vadd.f32 %v2189_v27, %v2140_v23  ;;  %v2152_v0 = vmul.f32 0.5, %v2116_v5 }
 0x7e9   : > { %v2167_v56 = vmul.f32 0.044715, %v2142_v34  ;;  %v2176_v37 = vmul.f32 %v2164_v47, %v2116_v5  ;;  %v2213_v39 = vmul.f32 0.7978846, %v2201_v33  ;;  %v2155_v58 = vmul.f32 0.5, %v2142_v34 }
 0x7eb   : > { %v2179_v38 = vmul.f32 %v2167_v56, %v2142_v34  ;;  %v2188_v41 = vmul.f32 %v2176_v37, %v2116_v5  ;;  %3709 = vtanh.f32 %v2213_v39 }
 0x7ec   : > { %v2117_v42 = vpop.f32.mrf.mxu3 }
 0x7ed   : > { %v2118_v45 = vadd.f32 %v2117_v42, %v4850_v26  ;;  %v2191_v24 = vmul.f32 %v2179_v38, %v2142_v34  ;;  %v2200_v32 = vadd.f32 %v2188_v41, %v2116_v5 }
 0x7ef   : > { %v2166_v25 = vmul.f32 0.044715, %v2118_v45  ;;  %v2203_v51 = vadd.f32 %v2191_v24, %v2142_v34  ;;  %v2212_v29 = vmul.f32 0.7978846, %v2200_v32  ;;  %v2154_v1 = vmul.f32 0.5, %v2118_v45 }
 0x7f1   : > { %v2215_v30 = vmul.f32 0.7978846, %v2203_v51  ;;  %v2178_v43 = vmul.f32 %v2166_v25, %v2118_v45  ;;  %v3710_v40 = vpop.eup %3709 }
 0x7f2   : > { %v2237_v54 = vadd.f32 1.0, %v3710_v40 }
 0x7f3   : > { %3711 = vtanh.f32 %v2215_v30  ;;  %v2190_v18 = vmul.f32 %v2178_v43, %v2118_v45 }
 0x7f4   : > { %3713 = vtanh.f32 %v2212_v29  ;;  %v2249_v52 = vmul.f32 %v2237_v54, %v2153_v57 }
 0x7f5   : > { %v2202_v28 = vadd.f32 %v2190_v18, %v2118_v45 }
 0x7f7   : > { %v2214_v53 = vmul.f32 0.7978846, %v2202_v28 }
 0x7f9   : > { %v3712_v2 = vpop.eup %3711  ;;  %3715 = vtanh.f32 %v2214_v53 }
 0x7fa   : > { %v2239_v26 = vadd.f32 1.0, %v3712_v2  ;;  %v3714_v35 = vpop.eup %3713 }
 0x7fb   : > { %v2236_v60 = vadd.f32 1.0, %v3714_v35 }
 0x7fc   : > { %v2251_v62 = vmul.f32 %v2239_v26, %v2155_v58 }
 0x7fd   : > { %v2248_v8 = vmul.f32 %v2236_v60, %v2152_v0 }
 0x7fe   : > { %v2257_v31 = vpack.c.bf16 %v2251_v62, %v2249_v52 }
 0x7ff   : > { %v3716_v61 = vpop.eup %3715 }
 0x800   : > { %2432 = vmatmul.bf16.gmra.mxu2 %v2257_v31  ;;  %v2238_v4 = vadd.f32 1.0, %v3716_v61 }
 0x802   : > { %v2250_v9 = vmul.f32 %v2238_v4, %v2154_v1 }
 0x804   : > { %v2256_v3 = vpack.c.bf16 %v2250_v9, %v2248_v8 }
 0x806   : > { %2408 = vmatmul.bf16.gmra.mxu1 %v2256_v3 }
 0x840   : > { %v2399_v12 = vpop.f32.mrf.mxu1  ;;  %v2423_v13 = vpop.f32.mrf.mxu2 }
 0x841   : > { %v2400_v59 = vadd.f32 %v3628_v11, %v2399_v12 }
 0x843   : > { %v2424_v14 = vadd.f32 %v2423_v13, %v2400_v59 }
 0x845   : > { %v2438_v15 = vadd.f32 %v2424_v14, %v4797_v36 }
 0x847   : > { %2446 = vadd.xlane.f32.xlu1 %v2438_v15 }
 0x848   : > { %v2401_v63 = vpop.f32.mrf.mxu1  ;;  %v2425_v20 = vpop.f32.mrf.mxu2 }
 0x849   : > { %v2402_v16 = vadd.f32 %v3628_v11, %v2401_v63  ;;  %v4904_v63 = vld [vmem:[%s955_s8] ss:$0 sm:$0xff] }
 0x84b   : > { %v2426_v21 = vadd.f32 %v2425_v20, %v2402_v16 }
 0x84d   : > { %v2439_v7 = vadd.f32 %v2426_v21, %v4800_v17  ;;  %v4911_v21 = vld [vmem:[%s958_s7] ss:$0 sm:$0xff] }
 0x84f   : > { %2448 = vadd.xlane.f32.xlu2 %v2439_v7 }
 0x85b   : > { %v2404_v10 = vpop.f32.mrf.mxu1  ;;  %v2428_v23 = vpop.f32.mrf.mxu2 }
 0x85c   : > { %v2405_v6 = vadd.f32 %v3628_v11, %v2404_v10 }
 0x85e   : > { %v2429_v46 = vadd.f32 %v2428_v23, %v2405_v6 }
 0x860   : > { %v2440_v49 = vadd.f32 %v2429_v46, %v4810_v48 }
 0x862   : > { %2450 = vadd.xlane.f32.xlu0 %v2440_v49 }
 0x863   : > { %v2406_v5 = vpop.f32.mrf.mxu1  ;;  %v2430_v19 = vpop.f32.mrf.mxu2 }
 0x864   : > { %v2407_v27 = vadd.f32 %v3628_v11, %v2406_v5 }
 0x866   : > { %v2431_v47 = vadd.f32 %v2430_v19, %v2407_v27 }
 0x868   : > { %v2441_v36 = vadd.f32 %v2431_v47, %v4813_v55 }
 0x86a   : > { %2452 = vadd.xlane.f32.xlu1 %v2441_v36 }
 0x883   : > { %v2409_v34 = vpop.f32.mrf.mxu1  ;;  %v2433_v33 = vpop.f32.mrf.mxu2 }
 0x884   : > { %v2410_v56 = vadd.f32 %v3628_v11, %v2409_v34 }
 0x886   : > { %v2434_v37 = vadd.f32 %v2433_v33, %v2410_v56 }
 0x888   : > { %v2442_v17 = vadd.f32 %v2434_v37, %v4824_v22 }
 0x88a   : > { %2454 = vadd.xlane.f32.xlu2 %v2442_v17 }
 0x88b   : > { %v2411_v38 = vpop.f32.mrf.mxu1  ;;  %v2435_v41 = vpop.f32.mrf.mxu2 }
 0x88c   : > { %v2412_v39 = vadd.f32 %v3628_v11, %v2411_v38 }
 0x88e   : > { %v2436_v42 = vadd.f32 %v2435_v41, %v2412_v39 }
 0x890   : > { %v2443_v48 = vadd.f32 %v2436_v42, %v4827_v50 }
 0x892   : > { %2456 = vadd.xlane.f32.xlu0 %v2443_v48 }
 0x8ba   : > { %v2447_v45 = vpop.xlane.xlu1 %2446 }
 0x8bb   : > { %v2458_v24 = vmul.f32 %v2447_v45, %v4711_v44 }
 0x8bd   : > { %v2464_v32 = vsub.f32 %v2438_v15, %v2458_v24 }
 0x8bf   : > { %v2470_v55 = vmul.f32 %v2464_v32, %v2464_v32 }
 0x8c1   : > { %2476 = vadd.xlane.f32.xlu1 %v2470_v55 }
 0x8c2   : > { %v2449_v25 = vpop.xlane.xlu2 %2448 }
 0x8c3   : > { %v2459_v51 = vmul.f32 %v2449_v25, %v4711_v44 }
 0x8c5   : > { %v2465_v30 = vsub.f32 %v2439_v7, %v2459_v51 }
 0x8c7   : > { %v2471_v43 = vmul.f32 %v2465_v30, %v2465_v30 }
 0x8c9   : > { %2478 = vadd.xlane.f32.xlu2 %v2471_v43 }
 0x8d5   : > { %v2451_v22 = vpop.xlane.xlu0 %2450 }
 0x8d6   : > { %v2460_v29 = vmul.f32 %v2451_v22, %v4711_v44 }
 0x8d8   : > { %v4878_v18 = vsub.f32 %v2440_v49, %v2460_v29 }
 0x8da   : > { %v2472_v50 = vmul.f32 %v4878_v18, %v4878_v18 }
 0x8dc   : > { %2480 = vadd.xlane.f32.xlu0 %v2472_v50 }
 0x8dd   : > { %v2453_v40 = vpop.xlane.xlu1 %2452 }
 0x8de   : > { %v2461_v28 = vmul.f32 %v2453_v40, %v4711_v44 }
 0x8e0   : > { %v4883_v53 = vsub.f32 %v2441_v36, %v2461_v28 }
 0x8e2   : > { %v2473_v54 = vmul.f32 %v4883_v53, %v4883_v53 }
 0x8e4   : > { %2482 = vadd.xlane.f32.xlu1 %v2473_v54 }
 0x8fd   : > { %v2455_v2 = vpop.xlane.xlu2 %2454 }
 0x8fe   : > { %v2462_v57 = vmul.f32 %v2455_v2, %v4711_v44 }
 0x900   : > { %v4888_v58 = vsub.f32 %v2442_v17, %v2462_v57 }
 0x902   : > { %v2474_v26 = vmul.f32 %v4888_v58, %v4888_v58 }
 0x904   : > { %2484 = vadd.xlane.f32.xlu2 %v2474_v26 }
 0x905   : > { %v2457_v35 = vpop.xlane.xlu0 %2456 }
 0x906   : > { %v2463_v52 = vmul.f32 %v2457_v35, %v4711_v44 }
 0x908   : > { %v4893_v62 = vsub.f32 %v2443_v48, %v2463_v52 }
 0x90a   : > { %v2475_v31 = vmul.f32 %v4893_v62, %v4893_v62 }
 0x90c   : > { %2486 = vadd.xlane.f32.xlu0 %v2475_v31 }
 0x934   : > { %v2477_v60 = vpop.xlane.xlu1 %2476 }
 0x935   : > { %v2488_v61 = vmul.f32 %v2477_v60, %v4711_v44 }
 0x937   : > { %v2494_v0 = vadd.f32 1e-12, %v2488_v61 }
 0x939   : > { %3717 = vrsqrt.f32 %v2494_v0  ;;  %vm2506_vm10 = vweird.f32 %v2494_v0 }
 0x93c   : > { %v2479_v1 = vpop.xlane.xlu2 %2478 }
 0x93d   : > { %v2489_v4 = vmul.f32 %v2479_v1, %v4711_v44 }
 0x93f   : > { %v3718_v8 = vpop.eup %3717  ;;  %v2495_v9 = vadd.f32 1e-12, %v2489_v4 }
 0x940   : > { %v2501_v3 = vmul.f32 %v3718_v8, %v2494_v0  ;;  %vm2507_vm9 = vweird.f32 %v3718_v8 }
 0x941   : > { %3719 = vrsqrt.f32 %v2495_v9  ;;  %vm2508_vm11 = vmor %vm2506_vm10, %vm2507_vm9  ;;  %vm2516_vm13 = vweird.f32 %v2495_v9 }
 0x942   : > { %v2502_v11 = vmul.f32 %v3718_v8, %v2501_v3 }
 0x944   : > { %v2503_v12 = vmul.f32 0.5, %v2502_v11 }
 0x946   : > { %v2504_v13 = vsub.f32 1.5, %v2503_v12 }
 0x947   : > { %v3720_v59 = vpop.eup %3719 }
 0x948   : > { %v2505_v14 = vmul.f32 %v3718_v8, %v2504_v13  ;;  %v2511_v15 = vmul.f32 %v3720_v59, %v2495_v9  ;;  %vm2517_vm12 = vweird.f32 %v3720_v59 }
 0x949   : > { %vm2518_vm14 = vmor %vm2516_vm13, %vm2517_vm12 }
 0x94a   : > { %v2509_v16 = vsel %vm2508_vm11, %v3718_v8, %v2505_v14  ;;  %v2512_v20 = vmul.f32 %v3720_v59, %v2511_v15 }
 0x94b   : > { %v2560_v7 = vmul.f32 %v2509_v16, %v2464_v32 }
 0x94c   : > { %v2513_v10 = vmul.f32 0.5, %v2512_v20 }
 0x94d   : > { %v2569_v23 = vmul.f32 %v4904_v63, %v2560_v7 }
 0x94e   : > { %v2514_v6 = vsub.f32 1.5, %v2513_v10 }
 0x94f   : > { %v4915_v46 = vadd.f32 %v4911_v21, %v2569_v23  ;;  %v2481_v49 = vpop.xlane.xlu0 %2480 }
 0x950   : > { %v2515_v5 = vmul.f32 %v3720_v59, %v2514_v6  ;;  %v2490_v27 = vmul.f32 %v2481_v49, %v4711_v44 }
 0x951   : > { %2584 = vst [vmem:[#allocation2 + $0x28] sm:$0xff] %v4915_v46 }
 0x952   : > { %v2519_v19 = vsel %vm2518_vm14, %v3720_v59, %v2515_v5  ;;  %v2496_v47 = vadd.f32 1e-12, %v2490_v27 }
 0x953   : > { %v2561_v36 = vmul.f32 %v2519_v19, %v2465_v30 }
 0x954   : > { %3721 = vrsqrt.f32 %v2496_v47  ;;  %vm2526_vm0 = vweird.f32 %v2496_v47 }
 0x955   : > { %v2570_v34 = vmul.f32 %v4904_v63, %v2561_v36 }
 0x957   : > { %v4921_v33 = vadd.f32 %v4911_v21, %v2570_v34  ;;  %v2483_v56 = vpop.xlane.xlu1 %2482 }
 0x958   : > { %v2491_v37 = vmul.f32 %v2483_v56, %v4711_v44 }
 0x959   : > { %2585 = vst [vmem:[#allocation2 + $0x10] sm:$0xff] %v4921_v33 }
 0x95a   : > { %v3722_v17 = vpop.eup %3721  ;;  %v2497_v38 = vadd.f32 1e-12, %v2491_v37 }
 0x95b   : > { %v2521_v39 = vmul.f32 %v3722_v17, %v2496_v47  ;;  %vm2527_vm15 = vweird.f32 %v3722_v17 }
 0x95c   : > { %3723 = vrsqrt.f32 %v2497_v38  ;;  %vm2528_vm1 = vmor %vm2526_vm0, %vm2527_vm15  ;;  %vm2536_vm3 = vweird.f32 %v2497_v38 }
 0x95d   : > { %v2522_v41 = vmul.f32 %v3722_v17, %v2521_v39 }
 0x95f   : > { %v2523_v42 = vmul.f32 0.5, %v2522_v41 }
 0x961   : > { %v2524_v48 = vsub.f32 1.5, %v2523_v42 }
 0x962   : > { %v3724_v45 = vpop.eup %3723 }
 0x963   : > { %v2525_v24 = vmul.f32 %v3722_v17, %v2524_v48  ;;  %v2531_v32 = vmul.f32 %v3724_v45, %v2497_v38  ;;  %vm2537_vm2 = vweird.f32 %v3724_v45 }
 0x964   : > { %vm2538_vm5 = vmor %vm2536_vm3, %vm2537_vm2 }
 0x965   : > { %v2529_v55 = vsel %vm2528_vm1, %v3722_v17, %v2525_v24  ;;  %v2532_v25 = vmul.f32 %v3724_v45, %v2531_v32 }
 0x966   : > { %v2562_v51 = vmul.f32 %v2529_v55, %v4878_v18 }
 0x967   : > { %v2533_v30 = vmul.f32 0.5, %v2532_v25 }
 0x968   : > { %v2571_v43 = vmul.f32 %v4904_v63, %v2562_v51 }
 0x969   : > { %v2534_v22 = vsub.f32 1.5, %v2533_v30 }
 0x96a   : > { %v2580_v29 = vadd.f32 %v4911_v21, %v2571_v43 }
 0x96b   : > { %v2535_v50 = vmul.f32 %v3724_v45, %v2534_v22 }
 0x96c   : > { %2586 = vst [vmem:[#allocation2 + $0x8] sm:$0xff] %v2580_v29 }
 0x96d   : > { %v2539_v40 = vsel %vm2538_vm5, %v3724_v45, %v2535_v50 }
 0x96e   : > { %v2563_v28 = vmul.f32 %v2539_v40, %v4883_v53 }
 0x970   : > { %v2572_v54 = vmul.f32 %v4904_v63, %v2563_v28 }
 0x972   : > { %v2581_v2 = vadd.f32 %v4911_v21, %v2572_v54 }
 0x974   : > { %2587 = vst [vmem:[#allocation2] sm:$0xff] %v2581_v2 }
 0x977   : > { %v2485_v18 = vpop.xlane.xlu2 %2484 }
 0x978   : > { %v2492_v57 = vmul.f32 %v2485_v18, %v4711_v44 }
 0x97a   : > { %v2498_v26 = vadd.f32 1e-12, %v2492_v57 }
 0x97c   : > { %3725 = vrsqrt.f32 %v2498_v26  ;;  %vm2546_vm7 = vweird.f32 %v2498_v26 }
 0x97f   : > { %v2487_v35 = vpop.xlane.xlu0 %2486 }
 0x980   : > { %v2493_v52 = vmul.f32 %v2487_v35, %v4711_v44 }
 0x982   : > { %v3726_v31 = vpop.eup %3725  ;;  %v2499_v60 = vadd.f32 1e-12, %v2493_v52 }
 0x983   : > { %v2541_v61 = vmul.f32 %v3726_v31, %v2498_v26  ;;  %vm2547_vm6 = vweird.f32 %v3726_v31 }
 0x984   : > { %3727 = vrsqrt.f32 %v2499_v60  ;;  %vm2548_vm8 = vmor %vm2546_vm7, %vm2547_vm6  ;;  %vm2556_vm10 = vweird.f32 %v2499_v60 }
 0x985   : > { %v2542_v0 = vmul.f32 %v3726_v31, %v2541_v61 }
 0x987   : > { %v2543_v1 = vmul.f32 0.5, %v2542_v0 }
 0x989   : > { %v2544_v53 = vsub.f32 1.5, %v2543_v1 }
 0x98a   : > { %v3728_v4 = vpop.eup %3727 }
 0x98b   : > { %v2545_v8 = vmul.f32 %v3726_v31, %v2544_v53  ;;  %v2551_v9 = vmul.f32 %v3728_v4, %v2499_v60  ;;  %vm2557_vm9 = vweird.f32 %v3728_v4 }
 0x98c   : > { %vm2558_vm11 = vmor %vm2556_vm10, %vm2557_vm9 }
 0x98d   : > { %v2549_v3 = vsel %vm2548_vm8, %v3726_v31, %v2545_v8  ;;  %v2552_v11 = vmul.f32 %v3728_v4, %v2551_v9 }
 0x98e   : > { %v2564_v12 = vmul.f32 %v2549_v3, %v4888_v58 }
 0x98f   : > { %v2553_v13 = vmul.f32 0.5, %v2552_v11 }
 0x990   : > { %v2573_v44 = vmul.f32 %v4904_v63, %v2564_v12 }
 0x991   : > { %v2554_v59 = vsub.f32 1.5, %v2553_v13 }
 0x992   : > { %v2582_v14 = vadd.f32 %v4911_v21, %v2573_v44 }
 0x993   : > { %v2555_v15 = vmul.f32 %v3728_v4, %v2554_v59 }
 0x994   : > { %2588 = vst [vmem:[#allocation2 + $0x18] sm:$0xff] %v2582_v14 }
 0x995   : > { %v2559_v16 = vsel %vm2558_vm11, %v3728_v4, %v2555_v15 }
 0x996   : > { %v2565_v20 = vmul.f32 %v2559_v16, %v4893_v62 }
 0x998   : > { %v2574_v7 = vmul.f32 %v4904_v63, %v2565_v20  ;;  %2593 = sbr.rel (%p3345_p9) target bundleno = 2924 (0xb6c), region = 124 }
 0x99a   : > { %v2583_v10 = vadd.f32 %v4911_v21, %v2574_v7 }
 0x99c   : > { %2589 = vst [vmem:[#allocation2 + $0x20] sm:$0xff] %v2583_v10 }
 0x99d   : > { %v2598_v58 = vpack.c.bf16 %v2583_v10, %v2582_v14  ;;  %v3460_v23 = vld [vmem:[%s5126_s11 + $0x38] sm:$0xff]  ;;  %v2597_v6 = vpack.c.bf16 %v2581_v2, %v2580_v29  ;;  %v3459_v62 = vld [vmem:[%s5126_s11 + $0x30] sm:$0xff]  ;;  %v2596_v63 = vpack.c.bf16 %v4921_v33, %v4915_v46  ;;  %v3348_v21 = vld [vmem:[%s5127_s20] sm:$0xf]  ;;  %vm2726_vm12 = vcmask 15374  }
 0x99e   : > { %2690 = vmatpush.bf16.msra.mxu1 %v3460_v23  ;;  %v3452_v49 = vld [vmem:[%s5127_s20] sm:$0x30]  ;;  %v3458_v5 = vld [vmem:[%s5126_s11 + $0x28] sm:$0xff]  ;;  %v3456_v19 = vld [vmem:[%s5126_s11 + $0x18] sm:$0xff]  ;;  %vm2728_vm13 = vcmask 11272   ;;  %vm2745_vm14 = vcmask 1041408  }
 0x99f   : > { %2612 = vmatpush.bf16.msra.mxu0 %v2598_v58  ;;  %v3349_v27 = vor.u32 %v3452_v49, %v3348_v21  ;;  %v3457_v46 = vld [vmem:[%s5126_s11 + $0x20] sm:$0xff]  ;;  %v3455_v47 = vld [vmem:[%s5126_s11 + $0x10] sm:$0xff]  ;;  %v3454_v36 = vld [vmem:[%s5126_s11 + $0x8] sm:$0xff]  ;;  %vm2750_vm15 = vcmask 13320   ;;  %vm2770_vm0 = vcmask 7174   ;;  %vm2772_vm1 = vcmask 3072  }
 0x9a0   : > { %v3453_v34 = vld [vmem:[%s5126_s11] sm:$0xff] }
 0x9a1   : > { %v3729_v17 = vld [vmem:[%s5128_s1] ss:$0 sm:$0xff] }
 0x9a2   : > { %2691 = vmatpush.bf16.msra.mxu1 %v3459_v62 }
 0x9a3   : > { %2613 = vmatpush.bf16.msra.mxu0 %v2597_v6 }
 0x9a6   : > { %2692 = vmatpush.bf16.msra.mxu1 %v3458_v5 }
 0x9a7   : > { %2614 = vmatpush.bf16.msra.mxu0 %v2596_v63 }
 0x9aa   : > { %3350 = vmatmul.msk.bf16.vlgmr.msra.gmra.mxu0 %vm1436_vm4, %v3349_v27  ;;  %2693 = vmatpush.bf16.msra.mxu1 %v3457_v46  ;;  %vm2704_vm4 = vcmask 5120  }
 0x9ae   : > { %2694 = vmatpush.bf16.msra.mxu1 %v3456_v19 }
 0x9b2   : > { %2695 = vmatpush.bf16.msra.mxu1 %v3455_v47 }
 0x9b6   : > { %2696 = vmatpush.bf16.msra.mxu1 %v3454_v36 }
 0x9ba   : > { %2697 = vmatpush.bf16.msra.mxu1 %v3453_v34 }
 0xa27   : > { %v2616_v33 = vpop.f32.mrf.mxu0 }
 0xa2f   : > { %v2618_v56 = vpop.f32.mrf.mxu0 }
 0xa30   : > { %v2621_v37 = vpack.c.bf16 %v2618_v56, %v2616_v33 }
 0xa32   : > { %2698 = vmatmul.bf16.vlgmr.msra.gmra.mxu1 %v2621_v37 }
 0xaaf   : > { %v2699_v38 = vpop.f32.mrf.mxu1 }
 0xab0   : > { %v2700_v39 = vadd.f32 %v3729_v17, %v2699_v38 }
 0xab2   : > { %v2705_v41 = vsel %vm2704_vm4, %v2700_v39, -inf  ;;  %v2727_v25 = vsel %vm2726_vm12, %v2700_v39, -inf }
 0xab3   : > { %v2706_v42 = vrot.slane %v2705_v41, 4 }
 0xab5   : > { %v2707_v48 = vmax.f32 %v2705_v41, %v2706_v42 }
 0xab7   : > { %v2708_v45 = vrot.slane %v2707_v48, 2  ;;  %v2701_v24 = vpop.f32.mrf.mxu1 }
 0xab8   : > { %v2702_v32 = vadd.f32 %v3729_v17, %v2701_v24 }
 0xab9   : > { %v2709_v55 = vmax.f32 %v2707_v48, %v2708_v45 }
 0xaba   : > { %v2729_v51 = vsel %vm2728_vm13, %v2702_v32, -inf }
 0xabb   : > { %v2710_v30 = vrot.slane %v2709_v55, 1  ;;  %v2730_v43 = vmax.f32 %v2727_v25, %v2729_v51 }
 0xabd   : > { %v2711_v22 = vmax.f32 %v2709_v55, %v2710_v30  ;;  %v2731_v29 = vrot.slane %v2730_v43, 4 }
 0xabf   : > { %v2712_v50 = vsub.f32 %v2700_v39, %v2711_v22  ;;  %v2732_v40 = vmax.f32 %v2730_v43, %v2731_v29 }
 0xac1   : > { %v2713_v28 = vmul.f32 1.442695, %v2712_v50  ;;  %v2733_v54 = vrot.slane %v2732_v40, 2 }
 0xac3   : > { %3730 = vpow2.f32 %v2713_v28  ;;  %v2734_v2 = vmax.f32 %v2732_v40, %v2733_v54 }
 0xac5   : > { %v2735_v18 = vrot.slane %v2734_v2, 1 }
 0xac7   : > { %v2736_v57 = vmax.f32 %v2734_v2, %v2735_v18 }
 0xac9   : > { %v3731_v26 = vpop.eup %3730  ;;  %v2738_v35 = vsub.f32 %v2702_v32, %v2736_v57  ;;  %v2737_v52 = vsub.f32 %v2700_v39, %v2736_v57 }
 0xaca   : > { %v2715_v31 = vsel %vm2704_vm4, %v3731_v26, 0.0 }
 0xacb   : > { %v2716_v60 = vrot.slane %v2715_v31, 4  ;;  %v2741_v61 = vmul.f32 1.442695, %v2738_v35  ;;  %v2739_v0 = vmul.f32 1.442695, %v2737_v52 }
 0xacd   : > { %v2717_v1 = vadd.f32 %v2716_v60, %v2715_v31  ;;  %3732 = vpow2.f32 %v2741_v61 }
 0xace   : > { %3734 = vpow2.f32 %v2739_v0 }
 0xacf   : > { %v2718_v53 = vrot.slane %v2717_v1, 2 }
 0xad1   : > { %v2719_v4 = vadd.f32 %v2718_v53, %v2717_v1 }
 0xad3   : > { %v3733_v8 = vpop.eup %3732  ;;  %v2720_v9 = vrot.slane %v2719_v4, 1 }
 0xad4   : > { %v3735_v3 = vpop.eup %3734  ;;  %v2747_v11 = vrot.slane %v3733_v8, 6 }
 0xad5   : > { %v2721_v12 = vadd.f32 %v2720_v9, %v2719_v4  ;;  %v2746_v13 = vrot.slane %v3735_v3, 6 }
 0xad7   : > { %3736 = vlog2.f32 %v2721_v12  ;;  %v2748_v44 = vsel %vm2745_vm14, %v2746_v13, %v2747_v11 }
 0xad8   : > { %v2751_v59 = vsel %vm2750_vm15, %v2748_v44, 0.0 }
 0xad9   : > { %v2752_v14 = vrot.slane %v2751_v59, 4 }
 0xadb   : > { %v2753_v15 = vadd.f32 %v2752_v14, %v2751_v59 }
 0xadd   : > { %v3737_v16 = vpop.eup %3736  ;;  %v2754_v20 = vrot.slane %v2753_v15, 2 }
 0xade   : > { %v2723_v7 = vmul.f32 0.6931472, %v3737_v16 }
 0xadf   : > { %v2755_v10 = vadd.f32 %v2754_v20, %v2753_v15 }
 0xae0   : > { %v2724_v58 = vsub.f32 %v2712_v50, %v2723_v7 }
 0xae1   : > { %v2756_v23 = vrot.slane %v2755_v10, 1 }
 0xae2   : > { %2725 = vst.msk [vmem:[%s4367_s18] sm:$0x3f] %vm2704_vm4, %v2724_v58 }
 0xae3   : > { %v2757_v6 = vadd.f32 %v2756_v23, %v2755_v10 }
 0xae5   : > { %3738 = vlog2.f32 %v2757_v6 }
 0xaeb   : > { %v3739_v62 = vpop.eup %3738 }
 0xaec   : > { %v2759_v63 = vmul.f32 0.6931472, %v3739_v62 }
 0xaee   : > { %v2760_v21 = vsub.f32 %v2737_v52, %v2759_v63  ;;  %v2761_v49 = vsub.f32 %v2738_v35, %v2759_v63 }
 0xaf0   : > { %2764 = vrot.lane.b32.xlu0 %v2760_v21, %s3999_s10 }
 0xaf8   : > { %2766 = vrot.lane.b32.xlu0 %v2761_v49, %s3999_s10 }
 0xb62   : > { %v2765_v5 = vpop.permute.xlu0 %2764 }
 0xb63   : > { %2771 = vst.msk [vmem:[%s4372_s13 - $0x6] sm:$0xc0] %vm2770_vm0, %v2765_v5 }
 0xb6a   : > { %v2767_v27 = vpop.permute.xlu0 %2766 }
 0xb6b   : > { %2773 = vst.msk [vmem:[%s4372_s13 + $0x2] sm:$0xf] %vm2772_vm1, %v2767_v27 }
 0xb6c PF: > { %s5129_s25 = sld [smem:[#allocation22_spill]] }
 0xb6d   : > { %s5130_s1 = sld [smem:[#allocation14_spill]] }
 0xb6e   : > { %s5131_s22 = sld [smem:[#allocation15_spill]] }
 0xb6f   : > { %s5132_s23 = sld [smem:[#allocation24_spill]] }
 0xb70   : > { %s5133_s24 = sld [smem:[#allocation16_spill]] }
 0xb71   : > { %s5134_s2 = sld [smem:[#allocation17_spill]] }
 0xb72   : > { %s40_s4 = sadd.s32 1, %s5129_s25   ;;  %s5135_s25 = sld [smem:[#allocation26_spill]] }
 0xb73   : > { %p37_p10 = scmp.ge.s32.totalorder %s40_s4, 6   ;;  %s5136_s3 = sld [smem:[#allocation20_spill]] }
 0xb74   : > { %s5137_s26 = sld [smem:[#allocation21_spill]] }
 0xb75   : > { %s5138_s27 = sld [smem:[#allocation23_spill]]  ;;  %39 = sbr.rel (!%p37_p10) target bundleno = 33 (0x21), region = 231 }
 0xb76   : > { %s5139_s28 = sld [smem:[#allocation25_spill]] }
 0xb7a   :  { %2807 = vsyncpa [#allocation4], 1 }
 0xb7b   :  { %2809 = vsyncpa [#allocation4 + $0x1], 1 }
 0xb7c   :  { %2810 = vsyncpa [#allocation6], 1 }
 0xb7d   :  { %2812 = vsyncpa [#allocation6 + $0x1], 1 }
 0xb7e   :  { %2813 = vsyncpa [#allocation9], 1 }
 0xb7f   :  { %2815 = vsyncpa [#allocation9 + $0x1], 1 }

</bundles_post_ra>
